<compile_context>
chip_gen: v5e
topology: v5e:2x2
jax: 0.10.0
libtpu: 0.0.40
codegen_flags: <defaults>
</compile_context>

<pallas_src>
import functools

import jax
import jax.numpy as jnp
from jax.experimental import pallas as pl
from jax.experimental.pallas import tpu as pltpu

# ---- module-consistent "tiny" config (dim=64, n_head=4, d_head=d_model,
#      d_inner=d_model, depth=1), small sequence/batch for the demo ------------
DIM = 64           # transformer_dim (d_model); obs last dim == DIM (token_emb = Identity)
N_HEADS = 4
D_HEAD = DIM       # MemTransformerLM built with d_head = transformer_dim
D_INNER = DIM      # d_inner = transformer_dim
DEPTH = 1
SEQ_LEN = 8        # sequence_length (memory length == sequence_length)
CMEM_RATIO = 4
BATCH = 2
ACTION_SIZE = 4
HEAD_HIDDEN = 256  # MlpModel hidden_sizes=[256]

MXU_DTYPE = jnp.bfloat16  # bf16 MXU operands, f32 accumulation


# ------------------------------ in-kernel helpers -----------------------------
def _mm(a, b):
    """MXU matmul: bf16 operands, f32 accumulation."""
    return jnp.dot(a.astype(MXU_DTYPE), b.astype(MXU_DTYPE),
                   preferred_element_type=jnp.float32)


def _ln(x, w, b, eps=1e-5):
    """LayerNorm over the last dim, f32 math."""
    mean = jnp.mean(x, axis=-1, keepdims=True)
    var = jnp.mean(jnp.square(x - mean), axis=-1, keepdims=True)
    return (x - mean) * jax.lax.rsqrt(var + eps) * w + b


# -------------------------- fused transformer layer ---------------------------
def _layer_kernel(cat_ref, x_ref,
                  ln1w_ref, ln1b_ref, wqkv_ref, bqkv_ref, wo_ref, bo_ref,
                  ln2w_ref, ln2b_ref, w1_ref, b1_ref, w2_ref, b2_ref,
                  o_ref, *, batch, t_len, mem_len, n_heads, d_head):
    s_len = mem_len + t_len
    hd = n_heads * d_head
    scale = 1.0 / float(d_head) ** 0.5

    cat = cat_ref[...]                    # (B*S, D)  [mem ; x] per batch
    x = x_ref[...]                        # (B*T, D)  residual stream

    # Pre-LN + fused QKV projection (one wide, lane-dense matmul).
    catn = _ln(cat, ln1w_ref[...], ln1b_ref[...])
    qkv = _mm(catn, wqkv_ref[...]) + bqkv_ref[...]     # (B*S, 3*HD) f32

    # Causal mask (memory fully visible) -- identical for every (b, h),
    # built once per kernel invocation.
    qi = jax.lax.broadcasted_iota(jnp.int32, (t_len, s_len), 0)
    kj = jax.lax.broadcasted_iota(jnp.int32, (t_len, s_len), 1)
    mask = kj <= (qi + mem_len)

    # Attention: static unrolled loop over the (b, h) pairs (no grid steps).
    attn_rows = []
    for bi in range(batch):
        row0 = bi * s_len
        heads = []
        for h in range(n_heads):
            c0 = h * d_head
            q_bh = qkv[row0 + mem_len: row0 + s_len, c0: c0 + d_head]        # (T, Dh)
            k_bh = qkv[row0: row0 + s_len, hd + c0: hd + c0 + d_head]        # (S, Dh)
            v_bh = qkv[row0: row0 + s_len, 2 * hd + c0: 2 * hd + c0 + d_head]

            # scores = q @ k^T without materializing a transpose.
            sc = jax.lax.dot_general(
                q_bh.astype(MXU_DTYPE), k_bh.astype(MXU_DTYPE),
                dimension_numbers=(((1,), (1,)), ((), ())),
                preferred_element_type=jnp.float32) * scale                  # (T, S)
            sc = jnp.where(mask, sc, -1e30)
            sc_max = jnp.max(sc, axis=-1, keepdims=True)
            p = jnp.exp(sc - sc_max)
            inv = pl.reciprocal(jnp.sum(p, axis=-1, keepdims=True), approx=True)
            p = p * inv
            heads.append(_mm(p, v_bh))                                       # (T, Dh)
        attn_rows.append(jnp.concatenate(heads, axis=1))                     # (T, HD)
    attn = jnp.concatenate(attn_rows, axis=0)                                # (B*T, HD)

    # Out-projection + residual, then pre-LN FFN + residual (all in-kernel).
    x1 = x + _mm(attn, wo_ref[...]) + bo_ref[...]
    xn = _ln(x1, ln2w_ref[...], ln2b_ref[...])
    hmid = jnp.maximum(_mm(xn, w1_ref[...]) + b1_ref[...], 0.0)
    x2 = x1 + _mm(hmid, w2_ref[...]) + b2_ref[...]
    o_ref[...] = x2.astype(o_ref.dtype)


def _full2d(shape):
    return pl.BlockSpec(shape, lambda i: (0, 0))


def transformer_layer(x, mem, p):
    """Pre-LN Transformer-XL layer with sequence memory (single fused kernel).

    x: (B, T, D), mem: (B, M, D).  Returns (B, T, D).
    """
    b, t, d = x.shape
    m = mem.shape[1]
    s = m + t
    cat = jnp.concatenate([mem, x], axis=1).reshape(b * s, d)   # (B*S, D)
    x2d = x.reshape(b * t, d)

    args = (cat, x2d,
            p["ln1_w"], p["ln1_b"], p["w_qkv"], p["b_qkv"], p["wo"], p["bo"],
            p["ln2_w"], p["ln2_b"], p["w1"], p["b1"], p["w2"], p["b2"])

    out = pl.pallas_call(
        functools.partial(_layer_kernel, batch=b, t_len=t, mem_len=m,
                          n_heads=N_HEADS, d_head=D_HEAD),
        out_shape=jax.ShapeDtypeStruct((b * t, d), jnp.float32),
        grid=(1,),
        in_specs=[_full2d(a.shape) for a in args],
        out_specs=_full2d((b * t, d)),
        compiler_params=pltpu.CompilerParams(dimension_semantics=("arbitrary",)),
    )(*args)
    return out.reshape(b, t, d)


# ------------------------- fused policy / value heads -------------------------
def _heads_kernel(x_ref, w1_ref, b1_ref, w2v_ref, b2v_ref, w2p_ref, b2p_ref,
                  mu_ref, std_ref, val_ref, *, hidden, action_size):
    x = x_ref[...]                                               # (N, D)
    # Shared first layer: value and pi first-layer weights concatenated on lanes.
    h = jnp.maximum(_mm(x, w1_ref[...]) + b1_ref[...], 0.0)      # (N, 2*hidden)
    val = _mm(h[:, :hidden], w2v_ref[...]) + b2v_ref[...]        # (N, 1)
    piv = _mm(h[:, hidden:], w2p_ref[...]) + b2p_ref[...]        # (N, 2A)

    mu_ref[...] = jnp.tanh(piv[:, :action_size])
    z = piv[:, action_size:]
    # PyTorch Softplus (beta=1, threshold=20), f32 math.
    std_ref[...] = jnp.where(z > 20.0, z, jnp.log1p(jnp.exp(jnp.minimum(z, 20.0))))
    val_ref[...] = val


def heads_forward(flat, hp):
    n = flat.shape[0]
    args = (flat, hp["w1"], hp["b1"], hp["w2v"], hp["b2v"], hp["w2p"], hp["b2p"])
    return pl.pallas_call(
        functools.partial(_heads_kernel, hidden=HEAD_HIDDEN, action_size=ACTION_SIZE),
        out_shape=(jax.ShapeDtypeStruct((n, ACTION_SIZE), jnp.float32),
                   jax.ShapeDtypeStruct((n, ACTION_SIZE), jnp.float32),
                   jax.ShapeDtypeStruct((n, 1), jnp.float32)),
        grid=(1,),
        in_specs=[_full2d(a.shape) for a in args],
        out_specs=(_full2d((n, ACTION_SIZE)),
                   _full2d((n, ACTION_SIZE)),
                   _full2d((n, 1))),
        compiler_params=pltpu.CompilerParams(dimension_semantics=("arbitrary",)),
    )(*args)


# --------------------------- model (glue in JAX) -------------------------------
def transformer_xl_forward(observation, memory, params):
    """forward() for the T == sequence_length (optim_forward) branch.

    observation: (T, B, D) time-major;  memory: (DEPTH, B, SEQ_LEN, D).
    Returns mu (T,B,A), std (T,B,A), value (T,B,1).
    """
    t, b, d = observation.shape
    x = observation.transpose(1, 0, 2)                           # (B, T, D)
    for i in range(DEPTH):
        x = transformer_layer(x, memory[i], params["layers"][i])
    flat = x.transpose(1, 0, 2).reshape(t * b, d)                # (T*B, D)

    mu, std, value = heads_forward(flat, params["heads"])
    return (mu.reshape(t, b, ACTION_SIZE),
            std.reshape(t, b, ACTION_SIZE),
            value.reshape(t, b, 1))


def init_params(key):
    def nrm(k, shape, scale=0.05):
        return scale * jax.random.normal(k, shape, dtype=jnp.float32)

    hd = N_HEADS * D_HEAD
    keys = iter(jax.random.split(key, 6 * DEPTH + 4))
    layers = []
    for _ in range(DEPTH):
        layers.append(dict(
            ln1_w=jnp.ones((1, DIM), jnp.float32), ln1_b=jnp.zeros((1, DIM), jnp.float32),
            # fused Q|K|V projection
            w_qkv=nrm(next(keys), (DIM, 3 * hd)), b_qkv=jnp.zeros((1, 3 * hd), jnp.float32),
            wo=nrm(next(keys), (hd, DIM)), bo=jnp.zeros((1, DIM), jnp.float32),
            ln2_w=jnp.ones((1, DIM), jnp.float32), ln2_b=jnp.zeros((1, DIM), jnp.float32),
            w1=nrm(next(keys), (DIM, D_INNER)), b1=jnp.zeros((1, D_INNER), jnp.float32),
            w2=nrm(next(keys), (D_INNER, DIM)), b2=jnp.zeros((1, DIM), jnp.float32),
        ))
    heads = dict(
        # value-head and pi-head first layers fused along the output (lane) dim:
        # columns [:HEAD_HIDDEN] -> value head, [HEAD_HIDDEN:] -> pi head.
        w1=nrm(next(keys), (DIM, 2 * HEAD_HIDDEN)),
        b1=jnp.zeros((1, 2 * HEAD_HIDDEN), jnp.float32),
        w2v=nrm(next(keys), (HEAD_HIDDEN, 1)), b2v=jnp.zeros((1, 1), jnp.float32),
        w2p=nrm(next(keys), (HEAD_HIDDEN, 2 * ACTION_SIZE)),
        b2p=jnp.zeros((1, 2 * ACTION_SIZE), jnp.float32),
    )
    return dict(layers=layers, heads=heads)


if __name__ == "__main__":
    key = jax.random.PRNGKey(0)
    kp, kobs, kmem = jax.random.split(key, 3)

    params = init_params(kp)
    # observation.state: (T, B, state_size) with state_size == transformer_dim
    observation = jax.random.normal(kobs, (SEQ_LEN, BATCH, DIM), dtype=jnp.float32)
    # State.memory: (depth, B, sequence_length, transformer_dim)
    memory = 0.1 * jax.random.normal(kmem, (DEPTH, BATCH, SEQ_LEN, DIM), dtype=jnp.float32)
    # State.compressed_memory exists in the module state but is unused (compressed_mem=None).
    compressed_memory = jnp.zeros((DEPTH, BATCH, SEQ_LEN // CMEM_RATIO, DIM), jnp.float32)

    mu, std, value = jax.jit(transformer_xl_forward)(observation, memory, params)
    jax.block_until_ready((mu, std, value))

    assert mu.shape == (SEQ_LEN, BATCH, ACTION_SIZE)
    assert std.shape == (SEQ_LEN, BATCH, ACTION_SIZE)
    assert value.shape == (SEQ_LEN, BATCH, 1)
    assert bool(jnp.all(jnp.isfinite(mu))) and bool(jnp.all(jnp.isfinite(std)))
    assert bool(jnp.all(std > 0.0))
    print("KERNEL_OK")
</pallas_src>

<mosaic_0001>
module attributes {stable_mosaic.version = 11 : i64} {
  func.func @_layer_kernel(%arg0: i32, %arg1: memref<32x64xf32, #tpu.memory_space<vmem>>, %arg2: memref<16x64xf32, #tpu.memory_space<vmem>>, %arg3: memref<1x64xf32, #tpu.memory_space<vmem>>, %arg4: memref<1x64xf32, #tpu.memory_space<vmem>>, %arg5: memref<64x768xf32, #tpu.memory_space<vmem>>, %arg6: memref<1x768xf32, #tpu.memory_space<vmem>>, %arg7: memref<256x64xf32, #tpu.memory_space<vmem>>, %arg8: memref<1x64xf32, #tpu.memory_space<vmem>>, %arg9: memref<1x64xf32, #tpu.memory_space<vmem>>, %arg10: memref<1x64xf32, #tpu.memory_space<vmem>>, %arg11: memref<64x64xf32, #tpu.memory_space<vmem>>, %arg12: memref<1x64xf32, #tpu.memory_space<vmem>>, %arg13: memref<64x64xf32, #tpu.memory_space<vmem>>, %arg14: memref<1x64xf32, #tpu.memory_space<vmem>>, %arg15: memref<16x64xf32, #tpu.memory_space<vmem>>) attributes {dimension_semantics = [#tpu.dimension_semantics<arbitrary>], iteration_bounds = array<i64: 1>, scalar_prefetch = 0 : i64, scratch_operands = 0 : i64, tpu.core_type = #tpu.core_type<tc>, window_params = [{pipeline_mode = #tpu.pipeline_mode<synchronous>, transform_indices = @transform_0, window_bounds = array<i64: 32, 64>}, {pipeline_mode = #tpu.pipeline_mode<synchronous>, transform_indices = @transform_1, window_bounds = array<i64: 16, 64>}, {pipeline_mode = #tpu.pipeline_mode<synchronous>, transform_indices = @transform_2, window_bounds = array<i64: 1, 64>}, {pipeline_mode = #tpu.pipeline_mode<synchronous>, transform_indices = @transform_3, window_bounds = array<i64: 1, 64>}, {pipeline_mode = #tpu.pipeline_mode<synchronous>, transform_indices = @transform_4, window_bounds = array<i64: 64, 768>}, {pipeline_mode = #tpu.pipeline_mode<synchronous>, transform_indices = @transform_5, window_bounds = array<i64: 1, 768>}, {pipeline_mode = #tpu.pipeline_mode<synchronous>, transform_indices = @transform_6, window_bounds = array<i64: 256, 64>}, {pipeline_mode = #tpu.pipeline_mode<synchronous>, transform_indices = @transform_7, window_bounds = array<i64: 1, 64>}, {pipeline_mode = #tpu.pipeline_mode<synchronous>, transform_indices = @transform_8, window_bounds = array<i64: 1, 64>}, {pipeline_mode = #tpu.pipeline_mode<synchronous>, transform_indices = @transform_9, window_bounds = array<i64: 1, 64>}, {pipeline_mode = #tpu.pipeline_mode<synchronous>, transform_indices = @transform_10, window_bounds = array<i64: 64, 64>}, {pipeline_mode = #tpu.pipeline_mode<synchronous>, transform_indices = @transform_11, window_bounds = array<i64: 1, 64>}, {pipeline_mode = #tpu.pipeline_mode<synchronous>, transform_indices = @transform_12, window_bounds = array<i64: 64, 64>}, {pipeline_mode = #tpu.pipeline_mode<synchronous>, transform_indices = @transform_13, window_bounds = array<i64: 1, 64>}, {pipeline_mode = #tpu.pipeline_mode<synchronous>, transform_indices = @transform_14, window_bounds = array<i64: 16, 64>}]} {
    %c0 = arith.constant 0 : index
    %c0_0 = arith.constant 0 : index
    %0 = vector.load %arg1[%c0, %c0_0] : memref<32x64xf32, #tpu.memory_space<vmem>>, vector<32x64xf32>
    %c0_1 = arith.constant 0 : index
    %c0_2 = arith.constant 0 : index
    %1 = vector.load %arg2[%c0_1, %c0_2] : memref<16x64xf32, #tpu.memory_space<vmem>>, vector<16x64xf32>
    %c0_3 = arith.constant 0 : index
    %c0_4 = arith.constant 0 : index
    %2 = vector.load %arg3[%c0_3, %c0_4] : memref<1x64xf32, #tpu.memory_space<vmem>>, vector<1x64xf32>
    %c0_5 = arith.constant 0 : index
    %c0_6 = arith.constant 0 : index
    %3 = vector.load %arg4[%c0_5, %c0_6] : memref<1x64xf32, #tpu.memory_space<vmem>>, vector<1x64xf32>
    %cst = arith.constant dense<0.000000e+00> : vector<32xf32>
    %4 = vector.multi_reduction <add>, %0, %cst [1] : vector<32x64xf32> to vector<32xf32>
    %5 = vector.shape_cast %4 : vector<32xf32> to vector<32x1xf32>
    %cst_7 = arith.constant 6.400000e+01 : f32
    %6 = vector.broadcast %cst_7 : f32 to vector<32x1xf32>
    %7 = arith.divf %5, %6 : vector<32x1xf32>
    %8 = vector.broadcast %7 : vector<32x1xf32> to vector<32x64xf32>
    %9 = arith.subf %0, %8 : vector<32x64xf32>
    %10 = arith.mulf %9, %9 : vector<32x64xf32>
    %cst_8 = arith.constant dense<0.000000e+00> : vector<32xf32>
    %11 = vector.multi_reduction <add>, %10, %cst_8 [1] : vector<32x64xf32> to vector<32xf32>
    %12 = vector.shape_cast %11 : vector<32xf32> to vector<32x1xf32>
    %cst_9 = arith.constant 6.400000e+01 : f32
    %13 = vector.broadcast %cst_9 : f32 to vector<32x1xf32>
    %14 = arith.divf %12, %13 : vector<32x1xf32>
    %15 = vector.broadcast %7 : vector<32x1xf32> to vector<32x64xf32>
    %16 = arith.subf %0, %15 : vector<32x64xf32>
    %cst_10 = arith.constant 9.99999974E-6 : f32
    %17 = vector.broadcast %cst_10 : f32 to vector<32x1xf32>
    %18 = arith.addf %14, %17 : vector<32x1xf32>
    %19 = math.rsqrt %18 : vector<32x1xf32>
    %20 = vector.broadcast %19 : vector<32x1xf32> to vector<32x64xf32>
    %21 = arith.mulf %16, %20 : vector<32x64xf32>
    %22 = vector.broadcast %2 : vector<1x64xf32> to vector<32x64xf32>
    %23 = arith.mulf %21, %22 : vector<32x64xf32>
    %24 = vector.broadcast %3 : vector<1x64xf32> to vector<32x64xf32>
    %25 = arith.addf %23, %24 : vector<32x64xf32>
    %c0_11 = arith.constant 0 : index
    %c0_12 = arith.constant 0 : index
    %26 = vector.load %arg5[%c0_11, %c0_12] : memref<64x768xf32, #tpu.memory_space<vmem>>, vector<64x768xf32>
    %27 = arith.truncf %25 : vector<32x64xf32> to vector<32x64xbf16>
    %28 = arith.truncf %26 : vector<64x768xf32> to vector<64x768xbf16>
    %cst_13 = arith.constant dense<0.000000e+00> : vector<32x768xf32>
    %29 = tpu.matmul %27, %28, %cst_13 {dimension_numbers = #tpu.dot_dimension_numbers<[1], [0], [0], [1], [0, 0, 1, 1], [], []>} : vector<32x64xbf16>, vector<64x768xbf16>, vector<32x768xf32> -> vector<32x768xf32>
    %c0_14 = arith.constant 0 : index
    %c0_15 = arith.constant 0 : index
    %30 = vector.load %arg6[%c0_14, %c0_15] : memref<1x768xf32, #tpu.memory_space<vmem>>, vector<1x768xf32>
    %31 = vector.broadcast %30 : vector<1x768xf32> to vector<32x768xf32>
    %32 = arith.addf %29, %31 : vector<32x768xf32>
    %33 = tpu.iota {dimensions = array<i32: 0>} : vector<8x16xi32>
    %34 = tpu.iota {dimensions = array<i32: 1>} : vector<8x16xi32>
    %c8_i32 = arith.constant 8 : i32
    %35 = vector.broadcast %c8_i32 : i32 to vector<8x16xi32>
    %36 = arith.addi %33, %35 : vector<8x16xi32>
    %37 = arith.cmpi sle, %34, %36 : vector<8x16xi32>
    %38 = vector.extract_strided_slice %32 {offsets = [8, 0], sizes = [8, 64], strides = [1, 1]} : vector<32x768xf32> to vector<8x64xf32>
    %39 = vector.extract_strided_slice %32 {offsets = [0, 256], sizes = [16, 64], strides = [1, 1]} : vector<32x768xf32> to vector<16x64xf32>
    %40 = vector.extract_strided_slice %32 {offsets = [0, 512], sizes = [16, 64], strides = [1, 1]} : vector<32x768xf32> to vector<16x64xf32>
    %41 = arith.truncf %38 : vector<8x64xf32> to vector<8x64xbf16>
    %42 = arith.truncf %39 : vector<16x64xf32> to vector<16x64xbf16>
    %cst_16 = arith.constant dense<0.000000e+00> : vector<8x16xf32>
    %43 = tpu.matmul %41, %42, %cst_16 {dimension_numbers = #tpu.dot_dimension_numbers<[1], [1], [0], [0], [0, 0, 1, 0], [], []>} : vector<8x64xbf16>, vector<16x64xbf16>, vector<8x16xf32> -> vector<8x16xf32>
    %cst_17 = arith.constant 1.250000e-01 : f32
    %44 = vector.broadcast %cst_17 : f32 to vector<8x16xf32>
    %45 = arith.mulf %43, %44 : vector<8x16xf32>
    %cst_18 = arith.constant -1.000000e+30 : f32
    %46 = vector.broadcast %cst_18 : f32 to vector<8x16xf32>
    %47 = arith.select %37, %45, %46 : vector<8x16xi1>, vector<8x16xf32>
    %cst_19 = arith.constant dense<0xFF800000> : vector<8xf32>
    %48 = vector.multi_reduction <maximumf>, %47, %cst_19 [1] : vector<8x16xf32> to vector<8xf32>
    %49 = vector.shape_cast %48 : vector<8xf32> to vector<8x1xf32>
    %50 = vector.broadcast %49 : vector<8x1xf32> to vector<8x16xf32>
    %51 = arith.subf %47, %50 : vector<8x16xf32>
    %52 = math.exp %51 : vector<8x16xf32>
    %cst_20 = arith.constant dense<0.000000e+00> : vector<8xf32>
    %53 = vector.multi_reduction <add>, %52, %cst_20 [1] : vector<8x16xf32> to vector<8xf32>
    %54 = vector.shape_cast %53 : vector<8xf32> to vector<8x1xf32>
    %55 = tpu.reciprocal %54 {approx = true} : vector<8x1xf32> -> vector<8x1xf32>
    %56 = vector.broadcast %55 : vector<8x1xf32> to vector<8x16xf32>
    %57 = arith.mulf %52, %56 : vector<8x16xf32>
    %58 = arith.truncf %57 : vector<8x16xf32> to vector<8x16xbf16>
    %59 = arith.truncf %40 : vector<16x64xf32> to vector<16x64xbf16>
    %cst_21 = arith.constant dense<0.000000e+00> : vector<8x64xf32>
    %60 = tpu.matmul %58, %59, %cst_21 {dimension_numbers = #tpu.dot_dimension_numbers<[1], [0], [0], [1], [0, 0, 1, 1], [], []>} : vector<8x16xbf16>, vector<16x64xbf16>, vector<8x64xf32> -> vector<8x64xf32>
    %61 = vector.extract_strided_slice %32 {offsets = [8, 64], sizes = [8, 64], strides = [1, 1]} : vector<32x768xf32> to vector<8x64xf32>
    %62 = vector.extract_strided_slice %32 {offsets = [0, 320], sizes = [16, 64], strides = [1, 1]} : vector<32x768xf32> to vector<16x64xf32>
    %63 = vector.extract_strided_slice %32 {offsets = [0, 576], sizes = [16, 64], strides = [1, 1]} : vector<32x768xf32> to vector<16x64xf32>
    %64 = arith.truncf %61 : vector<8x64xf32> to vector<8x64xbf16>
    %65 = arith.truncf %62 : vector<16x64xf32> to vector<16x64xbf16>
    %cst_22 = arith.constant dense<0.000000e+00> : vector<8x16xf32>
    %66 = tpu.matmul %64, %65, %cst_22 {dimension_numbers = #tpu.dot_dimension_numbers<[1], [1], [0], [0], [0, 0, 1, 0], [], []>} : vector<8x64xbf16>, vector<16x64xbf16>, vector<8x16xf32> -> vector<8x16xf32>
    %cst_23 = arith.constant 1.250000e-01 : f32
    %67 = vector.broadcast %cst_23 : f32 to vector<8x16xf32>
    %68 = arith.mulf %66, %67 : vector<8x16xf32>
    %cst_24 = arith.constant -1.000000e+30 : f32
    %69 = vector.broadcast %cst_24 : f32 to vector<8x16xf32>
    %70 = arith.select %37, %68, %69 : vector<8x16xi1>, vector<8x16xf32>
    %cst_25 = arith.constant dense<0xFF800000> : vector<8xf32>
    %71 = vector.multi_reduction <maximumf>, %70, %cst_25 [1] : vector<8x16xf32> to vector<8xf32>
    %72 = vector.shape_cast %71 : vector<8xf32> to vector<8x1xf32>
    %73 = vector.broadcast %72 : vector<8x1xf32> to vector<8x16xf32>
    %74 = arith.subf %70, %73 : vector<8x16xf32>
    %75 = math.exp %74 : vector<8x16xf32>
    %cst_26 = arith.constant dense<0.000000e+00> : vector<8xf32>
    %76 = vector.multi_reduction <add>, %75, %cst_26 [1] : vector<8x16xf32> to vector<8xf32>
    %77 = vector.shape_cast %76 : vector<8xf32> to vector<8x1xf32>
    %78 = tpu.reciprocal %77 {approx = true} : vector<8x1xf32> -> vector<8x1xf32>
    %79 = vector.broadcast %78 : vector<8x1xf32> to vector<8x16xf32>
    %80 = arith.mulf %75, %79 : vector<8x16xf32>
    %81 = arith.truncf %80 : vector<8x16xf32> to vector<8x16xbf16>
    %82 = arith.truncf %63 : vector<16x64xf32> to vector<16x64xbf16>
    %cst_27 = arith.constant dense<0.000000e+00> : vector<8x64xf32>
    %83 = tpu.matmul %81, %82, %cst_27 {dimension_numbers = #tpu.dot_dimension_numbers<[1], [0], [0], [1], [0, 0, 1, 1], [], []>} : vector<8x16xbf16>, vector<16x64xbf16>, vector<8x64xf32> -> vector<8x64xf32>
    %84 = vector.extract_strided_slice %32 {offsets = [8, 128], sizes = [8, 64], strides = [1, 1]} : vector<32x768xf32> to vector<8x64xf32>
    %85 = vector.extract_strided_slice %32 {offsets = [0, 384], sizes = [16, 64], strides = [1, 1]} : vector<32x768xf32> to vector<16x64xf32>
    %86 = vector.extract_strided_slice %32 {offsets = [0, 640], sizes = [16, 64], strides = [1, 1]} : vector<32x768xf32> to vector<16x64xf32>
    %87 = arith.truncf %84 : vector<8x64xf32> to vector<8x64xbf16>
    %88 = arith.truncf %85 : vector<16x64xf32> to vector<16x64xbf16>
    %cst_28 = arith.constant dense<0.000000e+00> : vector<8x16xf32>
    %89 = tpu.matmul %87, %88, %cst_28 {dimension_numbers = #tpu.dot_dimension_numbers<[1], [1], [0], [0], [0, 0, 1, 0], [], []>} : vector<8x64xbf16>, vector<16x64xbf16>, vector<8x16xf32> -> vector<8x16xf32>
    %cst_29 = arith.constant 1.250000e-01 : f32
    %90 = vector.broadcast %cst_29 : f32 to vector<8x16xf32>
    %91 = arith.mulf %89, %90 : vector<8x16xf32>
    %cst_30 = arith.constant -1.000000e+30 : f32
    %92 = vector.broadcast %cst_30 : f32 to vector<8x16xf32>
    %93 = arith.select %37, %91, %92 : vector<8x16xi1>, vector<8x16xf32>
    %cst_31 = arith.constant dense<0xFF800000> : vector<8xf32>
    %94 = vector.multi_reduction <maximumf>, %93, %cst_31 [1] : vector<8x16xf32> to vector<8xf32>
    %95 = vector.shape_cast %94 : vector<8xf32> to vector<8x1xf32>
    %96 = vector.broadcast %95 : vector<8x1xf32> to vector<8x16xf32>
    %97 = arith.subf %93, %96 : vector<8x16xf32>
    %98 = math.exp %97 : vector<8x16xf32>
    %cst_32 = arith.constant dense<0.000000e+00> : vector<8xf32>
    %99 = vector.multi_reduction <add>, %98, %cst_32 [1] : vector<8x16xf32> to vector<8xf32>
    %100 = vector.shape_cast %99 : vector<8xf32> to vector<8x1xf32>
    %101 = tpu.reciprocal %100 {approx = true} : vector<8x1xf32> -> vector<8x1xf32>
    %102 = vector.broadcast %101 : vector<8x1xf32> to vector<8x16xf32>
    %103 = arith.mulf %98, %102 : vector<8x16xf32>
    %104 = arith.truncf %103 : vector<8x16xf32> to vector<8x16xbf16>
    %105 = arith.truncf %86 : vector<16x64xf32> to vector<16x64xbf16>
    %cst_33 = arith.constant dense<0.000000e+00> : vector<8x64xf32>
    %106 = tpu.matmul %104, %105, %cst_33 {dimension_numbers = #tpu.dot_dimension_numbers<[1], [0], [0], [1], [0, 0, 1, 1], [], []>} : vector<8x16xbf16>, vector<16x64xbf16>, vector<8x64xf32> -> vector<8x64xf32>
    %107 = vector.extract_strided_slice %32 {offsets = [8, 192], sizes = [8, 64], strides = [1, 1]} : vector<32x768xf32> to vector<8x64xf32>
    %108 = vector.extract_strided_slice %32 {offsets = [0, 448], sizes = [16, 64], strides = [1, 1]} : vector<32x768xf32> to vector<16x64xf32>
    %109 = vector.extract_strided_slice %32 {offsets = [0, 704], sizes = [16, 64], strides = [1, 1]} : vector<32x768xf32> to vector<16x64xf32>
    %110 = arith.truncf %107 : vector<8x64xf32> to vector<8x64xbf16>
    %111 = arith.truncf %108 : vector<16x64xf32> to vector<16x64xbf16>
    %cst_34 = arith.constant dense<0.000000e+00> : vector<8x16xf32>
    %112 = tpu.matmul %110, %111, %cst_34 {dimension_numbers = #tpu.dot_dimension_numbers<[1], [1], [0], [0], [0, 0, 1, 0], [], []>} : vector<8x64xbf16>, vector<16x64xbf16>, vector<8x16xf32> -> vector<8x16xf32>
    %cst_35 = arith.constant 1.250000e-01 : f32
    %113 = vector.broadcast %cst_35 : f32 to vector<8x16xf32>
    %114 = arith.mulf %112, %113 : vector<8x16xf32>
    %cst_36 = arith.constant -1.000000e+30 : f32
    %115 = vector.broadcast %cst_36 : f32 to vector<8x16xf32>
    %116 = arith.select %37, %114, %115 : vector<8x16xi1>, vector<8x16xf32>
    %cst_37 = arith.constant dense<0xFF800000> : vector<8xf32>
    %117 = vector.multi_reduction <maximumf>, %116, %cst_37 [1] : vector<8x16xf32> to vector<8xf32>
    %118 = vector.shape_cast %117 : vector<8xf32> to vector<8x1xf32>
    %119 = vector.broadcast %118 : vector<8x1xf32> to vector<8x16xf32>
    %120 = arith.subf %116, %119 : vector<8x16xf32>
    %121 = math.exp %120 : vector<8x16xf32>
    %cst_38 = arith.constant dense<0.000000e+00> : vector<8xf32>
    %122 = vector.multi_reduction <add>, %121, %cst_38 [1] : vector<8x16xf32> to vector<8xf32>
    %123 = vector.shape_cast %122 : vector<8xf32> to vector<8x1xf32>
    %124 = tpu.reciprocal %123 {approx = true} : vector<8x1xf32> -> vector<8x1xf32>
    %125 = vector.broadcast %124 : vector<8x1xf32> to vector<8x16xf32>
    %126 = arith.mulf %121, %125 : vector<8x16xf32>
    %127 = arith.truncf %126 : vector<8x16xf32> to vector<8x16xbf16>
    %128 = arith.truncf %109 : vector<16x64xf32> to vector<16x64xbf16>
    %cst_39 = arith.constant dense<0.000000e+00> : vector<8x64xf32>
    %129 = tpu.matmul %127, %128, %cst_39 {dimension_numbers = #tpu.dot_dimension_numbers<[1], [0], [0], [1], [0, 0, 1, 1], [], []>} : vector<8x16xbf16>, vector<16x64xbf16>, vector<8x64xf32> -> vector<8x64xf32>
    %130 = tpu.concatenate %60, %83, %106, %129 in 1 : vector<8x64xf32>, vector<8x64xf32>, vector<8x64xf32>, vector<8x64xf32> -> vector<8x256xf32>
    %131 = vector.extract_strided_slice %32 {offsets = [24, 0], sizes = [8, 64], strides = [1, 1]} : vector<32x768xf32> to vector<8x64xf32>
    %132 = vector.extract_strided_slice %32 {offsets = [16, 256], sizes = [16, 64], strides = [1, 1]} : vector<32x768xf32> to vector<16x64xf32>
    %133 = vector.extract_strided_slice %32 {offsets = [16, 512], sizes = [16, 64], strides = [1, 1]} : vector<32x768xf32> to vector<16x64xf32>
    %134 = arith.truncf %131 : vector<8x64xf32> to vector<8x64xbf16>
    %135 = arith.truncf %132 : vector<16x64xf32> to vector<16x64xbf16>
    %cst_40 = arith.constant dense<0.000000e+00> : vector<8x16xf32>
    %136 = tpu.matmul %134, %135, %cst_40 {dimension_numbers = #tpu.dot_dimension_numbers<[1], [1], [0], [0], [0, 0, 1, 0], [], []>} : vector<8x64xbf16>, vector<16x64xbf16>, vector<8x16xf32> -> vector<8x16xf32>
    %cst_41 = arith.constant 1.250000e-01 : f32
    %137 = vector.broadcast %cst_41 : f32 to vector<8x16xf32>
    %138 = arith.mulf %136, %137 : vector<8x16xf32>
    %cst_42 = arith.constant -1.000000e+30 : f32
    %139 = vector.broadcast %cst_42 : f32 to vector<8x16xf32>
    %140 = arith.select %37, %138, %139 : vector<8x16xi1>, vector<8x16xf32>
    %cst_43 = arith.constant dense<0xFF800000> : vector<8xf32>
    %141 = vector.multi_reduction <maximumf>, %140, %cst_43 [1] : vector<8x16xf32> to vector<8xf32>
    %142 = vector.shape_cast %141 : vector<8xf32> to vector<8x1xf32>
    %143 = vector.broadcast %142 : vector<8x1xf32> to vector<8x16xf32>
    %144 = arith.subf %140, %143 : vector<8x16xf32>
    %145 = math.exp %144 : vector<8x16xf32>
    %cst_44 = arith.constant dense<0.000000e+00> : vector<8xf32>
    %146 = vector.multi_reduction <add>, %145, %cst_44 [1] : vector<8x16xf32> to vector<8xf32>
    %147 = vector.shape_cast %146 : vector<8xf32> to vector<8x1xf32>
    %148 = tpu.reciprocal %147 {approx = true} : vector<8x1xf32> -> vector<8x1xf32>
    %149 = vector.broadcast %148 : vector<8x1xf32> to vector<8x16xf32>
    %150 = arith.mulf %145, %149 : vector<8x16xf32>
    %151 = arith.truncf %150 : vector<8x16xf32> to vector<8x16xbf16>
    %152 = arith.truncf %133 : vector<16x64xf32> to vector<16x64xbf16>
    %cst_45 = arith.constant dense<0.000000e+00> : vector<8x64xf32>
    %153 = tpu.matmul %151, %152, %cst_45 {dimension_numbers = #tpu.dot_dimension_numbers<[1], [0], [0], [1], [0, 0, 1, 1], [], []>} : vector<8x16xbf16>, vector<16x64xbf16>, vector<8x64xf32> -> vector<8x64xf32>
    %154 = vector.extract_strided_slice %32 {offsets = [24, 64], sizes = [8, 64], strides = [1, 1]} : vector<32x768xf32> to vector<8x64xf32>
    %155 = vector.extract_strided_slice %32 {offsets = [16, 320], sizes = [16, 64], strides = [1, 1]} : vector<32x768xf32> to vector<16x64xf32>
    %156 = vector.extract_strided_slice %32 {offsets = [16, 576], sizes = [16, 64], strides = [1, 1]} : vector<32x768xf32> to vector<16x64xf32>
    %157 = arith.truncf %154 : vector<8x64xf32> to vector<8x64xbf16>
    %158 = arith.truncf %155 : vector<16x64xf32> to vector<16x64xbf16>
    %cst_46 = arith.constant dense<0.000000e+00> : vector<8x16xf32>
    %159 = tpu.matmul %157, %158, %cst_46 {dimension_numbers = #tpu.dot_dimension_numbers<[1], [1], [0], [0], [0, 0, 1, 0], [], []>} : vector<8x64xbf16>, vector<16x64xbf16>, vector<8x16xf32> -> vector<8x16xf32>
    %cst_47 = arith.constant 1.250000e-01 : f32
    %160 = vector.broadcast %cst_47 : f32 to vector<8x16xf32>
    %161 = arith.mulf %159, %160 : vector<8x16xf32>
    %cst_48 = arith.constant -1.000000e+30 : f32
    %162 = vector.broadcast %cst_48 : f32 to vector<8x16xf32>
    %163 = arith.select %37, %161, %162 : vector<8x16xi1>, vector<8x16xf32>
    %cst_49 = arith.constant dense<0xFF800000> : vector<8xf32>
    %164 = vector.multi_reduction <maximumf>, %163, %cst_49 [1] : vector<8x16xf32> to vector<8xf32>
    %165 = vector.shape_cast %164 : vector<8xf32> to vector<8x1xf32>
    %166 = vector.broadcast %165 : vector<8x1xf32> to vector<8x16xf32>
    %167 = arith.subf %163, %166 : vector<8x16xf32>
    %168 = math.exp %167 : vector<8x16xf32>
    %cst_50 = arith.constant dense<0.000000e+00> : vector<8xf32>
    %169 = vector.multi_reduction <add>, %168, %cst_50 [1] : vector<8x16xf32> to vector<8xf32>
    %170 = vector.shape_cast %169 : vector<8xf32> to vector<8x1xf32>
    %171 = tpu.reciprocal %170 {approx = true} : vector<8x1xf32> -> vector<8x1xf32>
    %172 = vector.broadcast %171 : vector<8x1xf32> to vector<8x16xf32>
    %173 = arith.mulf %168, %172 : vector<8x16xf32>
    %174 = arith.truncf %173 : vector<8x16xf32> to vector<8x16xbf16>
    %175 = arith.truncf %156 : vector<16x64xf32> to vector<16x64xbf16>
    %cst_51 = arith.constant dense<0.000000e+00> : vector<8x64xf32>
    %176 = tpu.matmul %174, %175, %cst_51 {dimension_numbers = #tpu.dot_dimension_numbers<[1], [0], [0], [1], [0, 0, 1, 1], [], []>} : vector<8x16xbf16>, vector<16x64xbf16>, vector<8x64xf32> -> vector<8x64xf32>
    %177 = vector.extract_strided_slice %32 {offsets = [24, 128], sizes = [8, 64], strides = [1, 1]} : vector<32x768xf32> to vector<8x64xf32>
    %178 = vector.extract_strided_slice %32 {offsets = [16, 384], sizes = [16, 64], strides = [1, 1]} : vector<32x768xf32> to vector<16x64xf32>
    %179 = vector.extract_strided_slice %32 {offsets = [16, 640], sizes = [16, 64], strides = [1, 1]} : vector<32x768xf32> to vector<16x64xf32>
    %180 = arith.truncf %177 : vector<8x64xf32> to vector<8x64xbf16>
    %181 = arith.truncf %178 : vector<16x64xf32> to vector<16x64xbf16>
    %cst_52 = arith.constant dense<0.000000e+00> : vector<8x16xf32>
    %182 = tpu.matmul %180, %181, %cst_52 {dimension_numbers = #tpu.dot_dimension_numbers<[1], [1], [0], [0], [0, 0, 1, 0], [], []>} : vector<8x64xbf16>, vector<16x64xbf16>, vector<8x16xf32> -> vector<8x16xf32>
    %cst_53 = arith.constant 1.250000e-01 : f32
    %183 = vector.broadcast %cst_53 : f32 to vector<8x16xf32>
    %184 = arith.mulf %182, %183 : vector<8x16xf32>
    %cst_54 = arith.constant -1.000000e+30 : f32
    %185 = vector.broadcast %cst_54 : f32 to vector<8x16xf32>
    %186 = arith.select %37, %184, %185 : vector<8x16xi1>, vector<8x16xf32>
    %cst_55 = arith.constant dense<0xFF800000> : vector<8xf32>
    %187 = vector.multi_reduction <maximumf>, %186, %cst_55 [1] : vector<8x16xf32> to vector<8xf32>
    %188 = vector.shape_cast %187 : vector<8xf32> to vector<8x1xf32>
    %189 = vector.broadcast %188 : vector<8x1xf32> to vector<8x16xf32>
    %190 = arith.subf %186, %189 : vector<8x16xf32>
    %191 = math.exp %190 : vector<8x16xf32>
    %cst_56 = arith.constant dense<0.000000e+00> : vector<8xf32>
    %192 = vector.multi_reduction <add>, %191, %cst_56 [1] : vector<8x16xf32> to vector<8xf32>
    %193 = vector.shape_cast %192 : vector<8xf32> to vector<8x1xf32>
    %194 = tpu.reciprocal %193 {approx = true} : vector<8x1xf32> -> vector<8x1xf32>
    %195 = vector.broadcast %194 : vector<8x1xf32> to vector<8x16xf32>
    %196 = arith.mulf %191, %195 : vector<8x16xf32>
    %197 = arith.truncf %196 : vector<8x16xf32> to vector<8x16xbf16>
    %198 = arith.truncf %179 : vector<16x64xf32> to vector<16x64xbf16>
    %cst_57 = arith.constant dense<0.000000e+00> : vector<8x64xf32>
    %199 = tpu.matmul %197, %198, %cst_57 {dimension_numbers = #tpu.dot_dimension_numbers<[1], [0], [0], [1], [0, 0, 1, 1], [], []>} : vector<8x16xbf16>, vector<16x64xbf16>, vector<8x64xf32> -> vector<8x64xf32>
    %200 = vector.extract_strided_slice %32 {offsets = [24, 192], sizes = [8, 64], strides = [1, 1]} : vector<32x768xf32> to vector<8x64xf32>
    %201 = vector.extract_strided_slice %32 {offsets = [16, 448], sizes = [16, 64], strides = [1, 1]} : vector<32x768xf32> to vector<16x64xf32>
    %202 = vector.extract_strided_slice %32 {offsets = [16, 704], sizes = [16, 64], strides = [1, 1]} : vector<32x768xf32> to vector<16x64xf32>
    %203 = arith.truncf %200 : vector<8x64xf32> to vector<8x64xbf16>
    %204 = arith.truncf %201 : vector<16x64xf32> to vector<16x64xbf16>
    %cst_58 = arith.constant dense<0.000000e+00> : vector<8x16xf32>
    %205 = tpu.matmul %203, %204, %cst_58 {dimension_numbers = #tpu.dot_dimension_numbers<[1], [1], [0], [0], [0, 0, 1, 0], [], []>} : vector<8x64xbf16>, vector<16x64xbf16>, vector<8x16xf32> -> vector<8x16xf32>
    %cst_59 = arith.constant 1.250000e-01 : f32
    %206 = vector.broadcast %cst_59 : f32 to vector<8x16xf32>
    %207 = arith.mulf %205, %206 : vector<8x16xf32>
    %cst_60 = arith.constant -1.000000e+30 : f32
    %208 = vector.broadcast %cst_60 : f32 to vector<8x16xf32>
    %209 = arith.select %37, %207, %208 : vector<8x16xi1>, vector<8x16xf32>
    %cst_61 = arith.constant dense<0xFF800000> : vector<8xf32>
    %210 = vector.multi_reduction <maximumf>, %209, %cst_61 [1] : vector<8x16xf32> to vector<8xf32>
    %211 = vector.shape_cast %210 : vector<8xf32> to vector<8x1xf32>
    %212 = vector.broadcast %211 : vector<8x1xf32> to vector<8x16xf32>
    %213 = arith.subf %209, %212 : vector<8x16xf32>
    %214 = math.exp %213 : vector<8x16xf32>
    %cst_62 = arith.constant dense<0.000000e+00> : vector<8xf32>
    %215 = vector.multi_reduction <add>, %214, %cst_62 [1] : vector<8x16xf32> to vector<8xf32>
    %216 = vector.shape_cast %215 : vector<8xf32> to vector<8x1xf32>
    %217 = tpu.reciprocal %216 {approx = true} : vector<8x1xf32> -> vector<8x1xf32>
    %218 = vector.broadcast %217 : vector<8x1xf32> to vector<8x16xf32>
    %219 = arith.mulf %214, %218 : vector<8x16xf32>
    %220 = arith.truncf %219 : vector<8x16xf32> to vector<8x16xbf16>
    %221 = arith.truncf %202 : vector<16x64xf32> to vector<16x64xbf16>
    %cst_63 = arith.constant dense<0.000000e+00> : vector<8x64xf32>
    %222 = tpu.matmul %220, %221, %cst_63 {dimension_numbers = #tpu.dot_dimension_numbers<[1], [0], [0], [1], [0, 0, 1, 1], [], []>} : vector<8x16xbf16>, vector<16x64xbf16>, vector<8x64xf32> -> vector<8x64xf32>
    %223 = tpu.concatenate %153, %176, %199, %222 in 1 : vector<8x64xf32>, vector<8x64xf32>, vector<8x64xf32>, vector<8x64xf32> -> vector<8x256xf32>
    %224 = tpu.concatenate %130, %223 in 0 : vector<8x256xf32>, vector<8x256xf32> -> vector<16x256xf32>
    %c0_64 = arith.constant 0 : index
    %c0_65 = arith.constant 0 : index
    %225 = vector.load %arg7[%c0_64, %c0_65] : memref<256x64xf32, #tpu.memory_space<vmem>>, vector<256x64xf32>
    %226 = arith.truncf %224 : vector<16x256xf32> to vector<16x256xbf16>
    %227 = arith.truncf %225 : vector<256x64xf32> to vector<256x64xbf16>
    %cst_66 = arith.constant dense<0.000000e+00> : vector<16x64xf32>
    %228 = tpu.matmul %226, %227, %cst_66 {dimension_numbers = #tpu.dot_dimension_numbers<[1], [0], [0], [1], [0, 0, 1, 1], [], []>} : vector<16x256xbf16>, vector<256x64xbf16>, vector<16x64xf32> -> vector<16x64xf32>
    %229 = arith.addf %1, %228 : vector<16x64xf32>
    %c0_67 = arith.constant 0 : index
    %c0_68 = arith.constant 0 : index
    %230 = vector.load %arg8[%c0_67, %c0_68] : memref<1x64xf32, #tpu.memory_space<vmem>>, vector<1x64xf32>
    %231 = vector.broadcast %230 : vector<1x64xf32> to vector<16x64xf32>
    %232 = arith.addf %229, %231 : vector<16x64xf32>
    %c0_69 = arith.constant 0 : index
    %c0_70 = arith.constant 0 : index
    %233 = vector.load %arg9[%c0_69, %c0_70] : memref<1x64xf32, #tpu.memory_space<vmem>>, vector<1x64xf32>
    %c0_71 = arith.constant 0 : index
    %c0_72 = arith.constant 0 : index
    %234 = vector.load %arg10[%c0_71, %c0_72] : memref<1x64xf32, #tpu.memory_space<vmem>>, vector<1x64xf32>
    %cst_73 = arith.constant dense<0.000000e+00> : vector<16xf32>
    %235 = vector.multi_reduction <add>, %232, %cst_73 [1] : vector<16x64xf32> to vector<16xf32>
    %236 = vector.shape_cast %235 : vector<16xf32> to vector<16x1xf32>
    %cst_74 = arith.constant 6.400000e+01 : f32
    %237 = vector.broadcast %cst_74 : f32 to vector<16x1xf32>
    %238 = arith.divf %236, %237 : vector<16x1xf32>
    %239 = vector.broadcast %238 : vector<16x1xf32> to vector<16x64xf32>
    %240 = arith.subf %232, %239 : vector<16x64xf32>
    %241 = arith.mulf %240, %240 : vector<16x64xf32>
    %cst_75 = arith.constant dense<0.000000e+00> : vector<16xf32>
    %242 = vector.multi_reduction <add>, %241, %cst_75 [1] : vector<16x64xf32> to vector<16xf32>
    %243 = vector.shape_cast %242 : vector<16xf32> to vector<16x1xf32>
    %cst_76 = arith.constant 6.400000e+01 : f32
    %244 = vector.broadcast %cst_76 : f32 to vector<16x1xf32>
    %245 = arith.divf %243, %244 : vector<16x1xf32>
    %246 = vector.broadcast %238 : vector<16x1xf32> to vector<16x64xf32>
    %247 = arith.subf %232, %246 : vector<16x64xf32>
    %cst_77 = arith.constant 9.99999974E-6 : f32
    %248 = vector.broadcast %cst_77 : f32 to vector<16x1xf32>
    %249 = arith.addf %245, %248 : vector<16x1xf32>
    %250 = math.rsqrt %249 : vector<16x1xf32>
    %251 = vector.broadcast %250 : vector<16x1xf32> to vector<16x64xf32>
    %252 = arith.mulf %247, %251 : vector<16x64xf32>
    %253 = vector.broadcast %233 : vector<1x64xf32> to vector<16x64xf32>
    %254 = arith.mulf %252, %253 : vector<16x64xf32>
    %255 = vector.broadcast %234 : vector<1x64xf32> to vector<16x64xf32>
    %256 = arith.addf %254, %255 : vector<16x64xf32>
    %c0_78 = arith.constant 0 : index
    %c0_79 = arith.constant 0 : index
    %257 = vector.load %arg11[%c0_78, %c0_79] : memref<64x64xf32, #tpu.memory_space<vmem>>, vector<64x64xf32>
    %258 = arith.truncf %256 : vector<16x64xf32> to vector<16x64xbf16>
    %259 = arith.truncf %257 : vector<64x64xf32> to vector<64x64xbf16>
    %cst_80 = arith.constant dense<0.000000e+00> : vector<16x64xf32>
    %260 = tpu.matmul %258, %259, %cst_80 {dimension_numbers = #tpu.dot_dimension_numbers<[1], [0], [0], [1], [0, 0, 1, 1], [], []>} : vector<16x64xbf16>, vector<64x64xbf16>, vector<16x64xf32> -> vector<16x64xf32>
    %c0_81 = arith.constant 0 : index
    %c0_82 = arith.constant 0 : index
    %261 = vector.load %arg12[%c0_81, %c0_82] : memref<1x64xf32, #tpu.memory_space<vmem>>, vector<1x64xf32>
    %262 = vector.broadcast %261 : vector<1x64xf32> to vector<16x64xf32>
    %263 = arith.addf %260, %262 : vector<16x64xf32>
    %cst_83 = arith.constant 0.000000e+00 : f32
    %264 = vector.broadcast %cst_83 : f32 to vector<16x64xf32>
    %265 = arith.maximumf %263, %264 : vector<16x64xf32>
    %c0_84 = arith.constant 0 : index
    %c0_85 = arith.constant 0 : index
    %266 = vector.load %arg13[%c0_84, %c0_85] : memref<64x64xf32, #tpu.memory_space<vmem>>, vector<64x64xf32>
    %267 = arith.truncf %265 : vector<16x64xf32> to vector<16x64xbf16>
    %268 = arith.truncf %266 : vector<64x64xf32> to vector<64x64xbf16>
    %cst_86 = arith.constant dense<0.000000e+00> : vector<16x64xf32>
    %269 = tpu.matmul %267, %268, %cst_86 {dimension_numbers = #tpu.dot_dimension_numbers<[1], [0], [0], [1], [0, 0, 1, 1], [], []>} : vector<16x64xbf16>, vector<64x64xbf16>, vector<16x64xf32> -> vector<16x64xf32>
    %270 = arith.addf %232, %269 : vector<16x64xf32>
    %c0_87 = arith.constant 0 : index
    %c0_88 = arith.constant 0 : index
    %271 = vector.load %arg14[%c0_87, %c0_88] : memref<1x64xf32, #tpu.memory_space<vmem>>, vector<1x64xf32>
    %272 = vector.broadcast %271 : vector<1x64xf32> to vector<16x64xf32>
    %273 = arith.addf %270, %272 : vector<16x64xf32>
    %c0_89 = arith.constant 0 : index
    %c0_90 = arith.constant 0 : index
    %274 = vector.load %arg15[%c0_89, %c0_90] : memref<16x64xf32, #tpu.memory_space<vmem>>, vector<16x64xf32>
    tpu.vector_store %arg15[%c0_89, %c0_90], %273 {strides = array<i32>} : memref<16x64xf32, #tpu.memory_space<vmem>>, vector<16x64xf32>,
    return
  }
  func.func @transform_0(%arg0: i32) -> (i32, i32) {
    %c0_i32 = arith.constant 0 : i32
    %c0_i32_0 = arith.constant 0 : i32
    %c0_i32_1 = arith.constant 0 : i32
    return %c0_i32, %c0_i32_0 : i32, i32
  }
  func.func @transform_1(%arg0: i32) -> (i32, i32) {
    %c0_i32 = arith.constant 0 : i32
    %c0_i32_0 = arith.constant 0 : i32
    %c0_i32_1 = arith.constant 0 : i32
    return %c0_i32, %c0_i32_0 : i32, i32
  }
  func.func @transform_2(%arg0: i32) -> (i32, i32) {
    %c0_i32 = arith.constant 0 : i32
    %c0_i32_0 = arith.constant 0 : i32
    %c0_i32_1 = arith.constant 0 : i32
    return %c0_i32, %c0_i32_0 : i32, i32
  }
  func.func @transform_3(%arg0: i32) -> (i32, i32) {
    %c0_i32 = arith.constant 0 : i32
    %c0_i32_0 = arith.constant 0 : i32
    %c0_i32_1 = arith.constant 0 : i32
    return %c0_i32, %c0_i32_0 : i32, i32
  }
  func.func @transform_4(%arg0: i32) -> (i32, i32) {
    %c0_i32 = arith.constant 0 : i32
    %c0_i32_0 = arith.constant 0 : i32
    %c0_i32_1 = arith.constant 0 : i32
    return %c0_i32, %c0_i32_0 : i32, i32
  }
  func.func @transform_5(%arg0: i32) -> (i32, i32) {
    %c0_i32 = arith.constant 0 : i32
    %c0_i32_0 = arith.constant 0 : i32
    %c0_i32_1 = arith.constant 0 : i32
    return %c0_i32, %c0_i32_0 : i32, i32
  }
  func.func @transform_6(%arg0: i32) -> (i32, i32) {
    %c0_i32 = arith.constant 0 : i32
    %c0_i32_0 = arith.constant 0 : i32
    %c0_i32_1 = arith.constant 0 : i32
    return %c0_i32, %c0_i32_0 : i32, i32
  }
  func.func @transform_7(%arg0: i32) -> (i32, i32) {
    %c0_i32 = arith.constant 0 : i32
    %c0_i32_0 = arith.constant 0 : i32
    %c0_i32_1 = arith.constant 0 : i32
    return %c0_i32, %c0_i32_0 : i32, i32
  }
  func.func @transform_8(%arg0: i32) -> (i32, i32) {
    %c0_i32 = arith.constant 0 : i32
    %c0_i32_0 = arith.constant 0 : i32
    %c0_i32_1 = arith.constant 0 : i32
    return %c0_i32, %c0_i32_0 : i32, i32
  }
  func.func @transform_9(%arg0: i32) -> (i32, i32) {
    %c0_i32 = arith.constant 0 : i32
    %c0_i32_0 = arith.constant 0 : i32
    %c0_i32_1 = arith.constant 0 : i32
    return %c0_i32, %c0_i32_0 : i32, i32
  }
  func.func @transform_10(%arg0: i32) -> (i32, i32) {
    %c0_i32 = arith.constant 0 : i32
    %c0_i32_0 = arith.constant 0 : i32
    %c0_i32_1 = arith.constant 0 : i32
    return %c0_i32, %c0_i32_0 : i32, i32
  }
  func.func @transform_11(%arg0: i32) -> (i32, i32) {
    %c0_i32 = arith.constant 0 : i32
    %c0_i32_0 = arith.constant 0 : i32
    %c0_i32_1 = arith.constant 0 : i32
    return %c0_i32, %c0_i32_0 : i32, i32
  }
  func.func @transform_12(%arg0: i32) -> (i32, i32) {
    %c0_i32 = arith.constant 0 : i32
    %c0_i32_0 = arith.constant 0 : i32
    %c0_i32_1 = arith.constant 0 : i32
    return %c0_i32, %c0_i32_0 : i32, i32
  }
  func.func @transform_13(%arg0: i32) -> (i32, i32) {
    %c0_i32 = arith.constant 0 : i32
    %c0_i32_0 = arith.constant 0 : i32
    %c0_i32_1 = arith.constant 0 : i32
    return %c0_i32, %c0_i32_0 : i32, i32
  }
  func.func @transform_14(%arg0: i32) -> (i32, i32) {
    %c0_i32 = arith.constant 0 : i32
    %c0_i32_0 = arith.constant 0 : i32
    %c0_i32_1 = arith.constant 0 : i32
    return %c0_i32, %c0_i32_0 : i32, i32
  }
}

module attributes {stable_mosaic.version = 11 : i64} {
  func.func @_heads_kernel(%arg0: i32, %arg1: memref<16x64xf32, #tpu.memory_space<vmem>>, %arg2: memref<64x512xf32, #tpu.memory_space<vmem>>, %arg3: memref<1x512xf32, #tpu.memory_space<vmem>>, %arg4: memref<256x1xf32, #tpu.memory_space<vmem>>, %arg5: memref<1x1xf32, #tpu.memory_space<vmem>>, %arg6: memref<256x8xf32, #tpu.memory_space<vmem>>, %arg7: memref<1x8xf32, #tpu.memory_space<vmem>>, %arg8: memref<16x4xf32, #tpu.memory_space<vmem>>, %arg9: memref<16x4xf32, #tpu.memory_space<vmem>>, %arg10: memref<16x1xf32, #tpu.memory_space<vmem>>) attributes {dimension_semantics = [#tpu.dimension_semantics<arbitrary>], iteration_bounds = array<i64: 1>, scalar_prefetch = 0 : i64, scratch_operands = 0 : i64, tpu.core_type = #tpu.core_type<tc>, window_params = [{pipeline_mode = #tpu.pipeline_mode<synchronous>, transform_indices = @transform_0, window_bounds = array<i64: 16, 64>}, {pipeline_mode = #tpu.pipeline_mode<synchronous>, transform_indices = @transform_1, window_bounds = array<i64: 64, 512>}, {pipeline_mode = #tpu.pipeline_mode<synchronous>, transform_indices = @transform_2, window_bounds = array<i64: 1, 512>}, {pipeline_mode = #tpu.pipeline_mode<synchronous>, transform_indices = @transform_3, window_bounds = array<i64: 256, 1>}, {pipeline_mode = #tpu.pipeline_mode<synchronous>, transform_indices = @transform_4, window_bounds = array<i64: 1, 1>}, {pipeline_mode = #tpu.pipeline_mode<synchronous>, transform_indices = @transform_5, window_bounds = array<i64: 256, 8>}, {pipeline_mode = #tpu.pipeline_mode<synchronous>, transform_indices = @transform_6, window_bounds = array<i64: 1, 8>}, {pipeline_mode = #tpu.pipeline_mode<synchronous>, transform_indices = @transform_7, window_bounds = array<i64: 16, 4>}, {pipeline_mode = #tpu.pipeline_mode<synchronous>, transform_indices = @transform_8, window_bounds = array<i64: 16, 4>}, {pipeline_mode = #tpu.pipeline_mode<synchronous>, transform_indices = @transform_9, window_bounds = array<i64: 16, 1>}]} {
    %c0 = arith.constant 0 : index
    %c0_0 = arith.constant 0 : index
    %0 = vector.load %arg1[%c0, %c0_0] : memref<16x64xf32, #tpu.memory_space<vmem>>, vector<16x64xf32>
    %c0_1 = arith.constant 0 : index
    %c0_2 = arith.constant 0 : index
    %1 = vector.load %arg2[%c0_1, %c0_2] : memref<64x512xf32, #tpu.memory_space<vmem>>, vector<64x512xf32>
    %2 = arith.truncf %0 : vector<16x64xf32> to vector<16x64xbf16>
    %3 = arith.truncf %1 : vector<64x512xf32> to vector<64x512xbf16>
    %cst = arith.constant dense<0.000000e+00> : vector<16x512xf32>
    %4 = tpu.matmul %2, %3, %cst {dimension_numbers = #tpu.dot_dimension_numbers<[1], [0], [0], [1], [0, 0, 1, 1], [], []>} : vector<16x64xbf16>, vector<64x512xbf16>, vector<16x512xf32> -> vector<16x512xf32>
    %c0_3 = arith.constant 0 : index
    %c0_4 = arith.constant 0 : index
    %5 = vector.load %arg3[%c0_3, %c0_4] : memref<1x512xf32, #tpu.memory_space<vmem>>, vector<1x512xf32>
    %6 = vector.broadcast %5 : vector<1x512xf32> to vector<16x512xf32>
    %7 = arith.addf %4, %6 : vector<16x512xf32>
    %cst_5 = arith.constant 0.000000e+00 : f32
    %8 = vector.broadcast %cst_5 : f32 to vector<16x512xf32>
    %9 = arith.maximumf %7, %8 : vector<16x512xf32>
    %10 = vector.extract_strided_slice %9 {offsets = [0, 0], sizes = [16, 256], strides = [1, 1]} : vector<16x512xf32> to vector<16x256xf32>
    %c0_6 = arith.constant 0 : index
    %c0_7 = arith.constant 0 : index
    %11 = vector.load %arg4[%c0_6, %c0_7] : memref<256x1xf32, #tpu.memory_space<vmem>>, vector<256x1xf32>
    %12 = arith.truncf %10 : vector<16x256xf32> to vector<16x256xbf16>
    %13 = arith.truncf %11 : vector<256x1xf32> to vector<256x1xbf16>
    %cst_8 = arith.constant dense<0.000000e+00> : vector<16x1xf32>
    %14 = tpu.matmul %12, %13, %cst_8 {dimension_numbers = #tpu.dot_dimension_numbers<[1], [0], [0], [1], [0, 0, 1, 1], [], []>} : vector<16x256xbf16>, vector<256x1xbf16>, vector<16x1xf32> -> vector<16x1xf32>
    %c0_9 = arith.constant 0 : index
    %c0_10 = arith.constant 0 : index
    %15 = vector.load %arg5[%c0_9, %c0_10] : memref<1x1xf32, #tpu.memory_space<vmem>>, vector<1x1xf32>
    %16 = vector.broadcast %15 : vector<1x1xf32> to vector<16x1xf32>
    %17 = arith.addf %14, %16 : vector<16x1xf32>
    %18 = vector.extract_strided_slice %9 {offsets = [0, 256], sizes = [16, 256], strides = [1, 1]} : vector<16x512xf32> to vector<16x256xf32>
    %c0_11 = arith.constant 0 : index
    %c0_12 = arith.constant 0 : index
    %19 = vector.load %arg6[%c0_11, %c0_12] : memref<256x8xf32, #tpu.memory_space<vmem>>, vector<256x8xf32>
    %20 = arith.truncf %18 : vector<16x256xf32> to vector<16x256xbf16>
    %21 = arith.truncf %19 : vector<256x8xf32> to vector<256x8xbf16>
    %cst_13 = arith.constant dense<0.000000e+00> : vector<16x8xf32>
    %22 = tpu.matmul %20, %21, %cst_13 {dimension_numbers = #tpu.dot_dimension_numbers<[1], [0], [0], [1], [0, 0, 1, 1], [], []>} : vector<16x256xbf16>, vector<256x8xbf16>, vector<16x8xf32> -> vector<16x8xf32>
    %c0_14 = arith.constant 0 : index
    %c0_15 = arith.constant 0 : index
    %23 = vector.load %arg7[%c0_14, %c0_15] : memref<1x8xf32, #tpu.memory_space<vmem>>, vector<1x8xf32>
    %24 = vector.broadcast %23 : vector<1x8xf32> to vector<16x8xf32>
    %25 = arith.addf %22, %24 : vector<16x8xf32>
    %26 = vector.extract_strided_slice %25 {offsets = [0, 0], sizes = [16, 4], strides = [1, 1]} : vector<16x8xf32> to vector<16x4xf32>
    %27 = math.tanh %26 : vector<16x4xf32>
    %c0_16 = arith.constant 0 : index
    %c0_17 = arith.constant 0 : index
    %28 = vector.load %arg8[%c0_16, %c0_17] : memref<16x4xf32, #tpu.memory_space<vmem>>, vector<16x4xf32>
    tpu.vector_store %arg8[%c0_16, %c0_17], %27 {strides = array<i32>} : memref<16x4xf32, #tpu.memory_space<vmem>>, vector<16x4xf32>,
    %29 = vector.extract_strided_slice %25 {offsets = [0, 4], sizes = [16, 4], strides = [1, 1]} : vector<16x8xf32> to vector<16x4xf32>
    %cst_18 = arith.constant 2.000000e+01 : f32
    %30 = vector.broadcast %cst_18 : f32 to vector<16x4xf32>
    %31 = arith.cmpf ogt, %29, %30 : vector<16x4xf32>
    %cst_19 = arith.constant 2.000000e+01 : f32
    %32 = vector.broadcast %cst_19 : f32 to vector<16x4xf32>
    %33 = arith.minimumf %29, %32 : vector<16x4xf32>
    %34 = math.exp %33 : vector<16x4xf32>
    %35 = math.log1p %34 : vector<16x4xf32>
    %36 = arith.select %31, %29, %35 : vector<16x4xi1>, vector<16x4xf32>
    %c0_20 = arith.constant 0 : index
    %c0_21 = arith.constant 0 : index
    %37 = vector.load %arg9[%c0_20, %c0_21] : memref<16x4xf32, #tpu.memory_space<vmem>>, vector<16x4xf32>
    tpu.vector_store %arg9[%c0_20, %c0_21], %36 {strides = array<i32>} : memref<16x4xf32, #tpu.memory_space<vmem>>, vector<16x4xf32>,
    %c0_22 = arith.constant 0 : index
    %c0_23 = arith.constant 0 : index
    %38 = vector.load %arg10[%c0_22, %c0_23] : memref<16x1xf32, #tpu.memory_space<vmem>>, vector<16x1xf32>
    tpu.vector_store %arg10[%c0_22, %c0_23], %17 {strides = array<i32>} : memref<16x1xf32, #tpu.memory_space<vmem>>, vector<16x1xf32>,
    return
  }
  func.func @transform_0(%arg0: i32) -> (i32, i32) {
    %c0_i32 = arith.constant 0 : i32
    %c0_i32_0 = arith.constant 0 : i32
    %c0_i32_1 = arith.constant 0 : i32
    return %c0_i32, %c0_i32_0 : i32, i32
  }
  func.func @transform_1(%arg0: i32) -> (i32, i32) {
    %c0_i32 = arith.constant 0 : i32
    %c0_i32_0 = arith.constant 0 : i32
    %c0_i32_1 = arith.constant 0 : i32
    return %c0_i32, %c0_i32_0 : i32, i32
  }
  func.func @transform_2(%arg0: i32) -> (i32, i32) {
    %c0_i32 = arith.constant 0 : i32
    %c0_i32_0 = arith.constant 0 : i32
    %c0_i32_1 = arith.constant 0 : i32
    return %c0_i32, %c0_i32_0 : i32, i32
  }
  func.func @transform_3(%arg0: i32) -> (i32, i32) {
    %c0_i32 = arith.constant 0 : i32
    %c0_i32_0 = arith.constant 0 : i32
    %c0_i32_1 = arith.constant 0 : i32
    return %c0_i32, %c0_i32_0 : i32, i32
  }
  func.func @transform_4(%arg0: i32) -> (i32, i32) {
    %c0_i32 = arith.constant 0 : i32
    %c0_i32_0 = arith.constant 0 : i32
    %c0_i32_1 = arith.constant 0 : i32
    return %c0_i32, %c0_i32_0 : i32, i32
  }
  func.func @transform_5(%arg0: i32) -> (i32, i32) {
    %c0_i32 = arith.constant 0 : i32
    %c0_i32_0 = arith.constant 0 : i32
    %c0_i32_1 = arith.constant 0 : i32
    return %c0_i32, %c0_i32_0 : i32, i32
  }
  func.func @transform_6(%arg0: i32) -> (i32, i32) {
    %c0_i32 = arith.constant 0 : i32
    %c0_i32_0 = arith.constant 0 : i32
    %c0_i32_1 = arith.constant 0 : i32
    return %c0_i32, %c0_i32_0 : i32, i32
  }
  func.func @transform_7(%arg0: i32) -> (i32, i32) {
    %c0_i32 = arith.constant 0 : i32
    %c0_i32_0 = arith.constant 0 : i32
    %c0_i32_1 = arith.constant 0 : i32
    return %c0_i32, %c0_i32_0 : i32, i32
  }
  func.func @transform_8(%arg0: i32) -> (i32, i32) {
    %c0_i32 = arith.constant 0 : i32
    %c0_i32_0 = arith.constant 0 : i32
    %c0_i32_1 = arith.constant 0 : i32
    return %c0_i32, %c0_i32_0 : i32, i32
  }
  func.func @transform_9(%arg0: i32) -> (i32, i32) {
    %c0_i32 = arith.constant 0 : i32
    %c0_i32_0 = arith.constant 0 : i32
    %c0_i32_1 = arith.constant 0 : i32
    return %c0_i32, %c0_i32_0 : i32, i32
  }
}

</mosaic_0001>

<bundles_post_ra>
// kernel: transformer_xl_forward.3
= control target key start
LH: loop header
LB: loop body
LE: loop exit
PB: predicated region body
PF: predicated region fallthrough
CT: control target
= control target key end

     0   :  { %vm93_vm0 = vcmask 523264   ;;  %vm327_vm1 = vcmask 31744   ;;  %s402_s28 = smov 124   ;;  %vm368_vm6 = vcmask 7168   ;;  %s794_s1 = inlined_call_operand.vmem [shape: f32[64,512], index: 1, kind: input, shape index: {}]   ;;  %s795_s5 = inlined_call_operand.vmem [shape: f32[256,8], index: 5, kind: input, shape index: {}]   ;;  %s796_s0 = inlined_call_operand.vmem [shape: f32[16,64], index: 0, kind: input, shape index: {}]   ;;  %s797_s3 = inlined_call_operand.vmem [shape: f32[256,1], index: 3, kind: input, shape index: {}]   ;;  %s798_s6 = inlined_call_operand.vmem [shape: f32[1,8], index: 6, kind: input, shape index: {}]   ;;  %s799_s2 = inlined_call_operand.vmem [shape: f32[1,512], index: 2, kind: input, shape index: {}]   ;;  %s800_s4 = inlined_call_operand.<no memory space> [shape: f32[1,1], index: 4, kind: input, shape index: {}]   ;;  %s801_s7 = inlined_call_operand.vmem [shape: f32[16,4], index: 7, kind: output, shape index: {0}]   ;;  %s802_s9 = inlined_call_operand.vmem [shape: f32[16,1], index: 9, kind: output, shape index: {2}]   ;;  %s803_s8 = inlined_call_operand.vmem [shape: f32[16,4], index: 8, kind: output, shape index: {1}]  }
   0x1   :  { %v60_v0 = vld [vmem:[%s794_s1 + $0xd0] sm:$0xff]  ;;  %v61_v2 = vld [vmem:[%s794_s1 + $0xd8] sm:$0xff]  ;;  %v58_v24 = vld [vmem:[%s794_s1 + $0xc0] sm:$0xff] }
   0x2   :  { %v64_v1 = vld [vmem:[%s794_s1 + $0xf0] sm:$0xff]  ;;  %v65_v4 = vld [vmem:[%s794_s1 + $0xf8] sm:$0xff]  ;;  %v62_v25 = vld [vmem:[%s794_s1 + $0xe0] sm:$0xff] }
   0x3   :  { %v81_v3 = vpack.c.bf16 %v64_v1, %v60_v0  ;;  %v52_v5 = vld [vmem:[%s794_s1 + $0x90] sm:$0xff]  ;;  %v82_v7 = vpack.c.bf16 %v65_v4, %v61_v2  ;;  %v53_v8 = vld [vmem:[%s794_s1 + $0x98] sm:$0xff]  ;;  %v59_v26 = vld [vmem:[%s794_s1 + $0xc8] sm:$0xff]  ;;  %v79_v31 = vpack.c.bf16 %v62_v25, %v58_v24 }
   0x4   :  { %v56_v6 = vld [vmem:[%s794_s1 + $0xb0] sm:$0xff]  ;;  %v57_v9 = vld [vmem:[%s794_s1 + $0xb8] sm:$0xff]  ;;  %v63_v27 = vld [vmem:[%s794_s1 + $0xe8] sm:$0xff] }
   0x5   :  { %129 = vmatpush.bf16.msra.mxu2 %v81_v3  ;;  %v77_v10 = vpack.c.bf16 %v56_v6, %v52_v5  ;;  %143 = vmatpush.bf16.msra.mxu3 %v82_v7  ;;  %v78_v11 = vpack.c.bf16 %v57_v9, %v53_v8  ;;  %v44_v12 = vld [vmem:[%s794_s1 + $0x50] sm:$0xff]  ;;  %v45_v14 = vld [vmem:[%s794_s1 + $0x58] sm:$0xff]  ;;  %v32_v28 = vld [vmem:[%s796_s0] sm:$0xff]  ;;  %v80_v32 = vpack.c.bf16 %v63_v27, %v59_v26 }
   0x6   :  { %v48_v13 = vld [vmem:[%s794_s1 + $0x70] sm:$0xff]  ;;  %v49_v15 = vld [vmem:[%s794_s1 + $0x78] sm:$0xff]  ;;  %v33_v34 = vld [vmem:[%s796_s0 + $0x8] sm:$0xff]  ;;  %101 = vmatpush.bf16.msra.mxu0 %v79_v31 }
   0x7   :  { %v36_v16 = vld [vmem:[%s794_s1 + $0x10] sm:$0xff]  ;;  %v73_v17 = vpack.c.bf16 %v48_v13, %v44_v12  ;;  %v37_v19 = vld [vmem:[%s794_s1 + $0x18] sm:$0xff]  ;;  %v74_v21 = vpack.c.bf16 %v49_v15, %v45_v14  ;;  %v50_v35 = vld [vmem:[%s794_s1 + $0x80] sm:$0xff]  ;;  %115 = vmatpush.bf16.msra.mxu1 %v80_v32  ;;  %v552_v46 = vpack.c.bf16 %v33_v34, %v32_v28 }
   0x8   :  { %v40_v18 = vld [vmem:[%s794_s1 + $0x30] sm:$0xff]  ;;  %v41_v20 = vld [vmem:[%s794_s1 + $0x38] sm:$0xff]  ;;  %v54_v36 = vld [vmem:[%s794_s1 + $0xa0] sm:$0xff] }
   0x9   :  { %130 = vmatpush.bf16.msra.mxu2 %v77_v10  ;;  %144 = vmatpush.bf16.msra.mxu3 %v78_v11  ;;  %v257_v22 = vld [vmem:[%s795_s5 + $0x70] sm:$0xff]  ;;  %v258_v23 = vld [vmem:[%s795_s5 + $0x78] sm:$0xff]  ;;  %v69_v33 = vpack.c.bf16 %v40_v18, %v36_v16  ;;  %v70_v37 = vpack.c.bf16 %v41_v20, %v37_v19  ;;  %v51_v39 = vld [vmem:[%s794_s1 + $0x88] sm:$0xff]  ;;  %v75_v45 = vpack.c.bf16 %v54_v36, %v50_v35 }
   0xa   :  { %v273_v29 = vld [vmem:[%s795_s5 + $0xf0] sm:$0xff]  ;;  %v274_v30 = vld [vmem:[%s795_s5 + $0xf8] sm:$0xff]  ;;  %v284_v38 = vpack.c.bf16 %v258_v23, %v257_v22  ;;  %v55_v40 = vld [vmem:[%s794_s1 + $0xa8] sm:$0xff] }
   0xb   :  { %v292_v41 = vpack.c.bf16 %v274_v30, %v273_v29  ;;  %v255_v42 = vld [vmem:[%s795_s5 + $0x60] sm:$0xff]  ;;  %v256_v43 = vld [vmem:[%s795_s5 + $0x68] sm:$0xff]  ;;  %v76_v48 = vpack.c.bf16 %v55_v40, %v51_v39  ;;  %v253_v55 = vld [vmem:[%s795_s5 + $0x50] sm:$0xff]  ;;  %102 = vmatpush.bf16.msra.mxu0 %v75_v45 }
   0xc   :  { %v271_v44 = vld [vmem:[%s795_s5 + $0xe0] sm:$0xff]  ;;  %v272_v47 = vld [vmem:[%s795_s5 + $0xe8] sm:$0xff]  ;;  %v283_v53 = vpack.c.bf16 %v256_v43, %v255_v42  ;;  %v254_v56 = vld [vmem:[%s795_s5 + $0x58] sm:$0xff] }
   0xd   :  { %131 = vmatpush.bf16.msra.mxu2 %v73_v17  ;;  %145 = vmatpush.bf16.msra.mxu3 %v74_v21  ;;  %v42_v49 = vld [vmem:[%s794_s1 + $0x40] sm:$0xff]  ;;  %v43_v51 = vld [vmem:[%s794_s1 + $0x48] sm:$0xff]  ;;  %v291_v54 = vpack.c.bf16 %v272_v47, %v271_v44  ;;  %v269_v58 = vld [vmem:[%s795_s5 + $0xd0] sm:$0xff]  ;;  %v282_v61 = vpack.c.bf16 %v254_v56, %v253_v55 }
   0xe   :  { %v46_v50 = vld [vmem:[%s794_s1 + $0x60] sm:$0xff]  ;;  %v47_v52 = vld [vmem:[%s794_s1 + $0x68] sm:$0xff]  ;;  %v270_v59 = vld [vmem:[%s795_s5 + $0xd8] sm:$0xff]  ;;  %116 = vmatpush.bf16.msra.mxu1 %v76_v48 }
   0xf   :  { %v71_v57 = vpack.c.bf16 %v46_v50, %v42_v49  ;;  %v72_v60 = vpack.c.bf16 %v47_v52, %v43_v51  ;;  %v290_v62 = vpack.c.bf16 %v270_v59, %v269_v58  ;;  %v251_v63 = vld [vmem:[%s795_s5 + $0x40] sm:$0xff]  ;;  %v252_v0 = vld [vmem:[%s795_s5 + $0x48] sm:$0xff]  ;;  %v249_v5 = vld [vmem:[%s795_s5 + $0x30] sm:$0xff] }
  0x10   :  { %v267_v1 = vld [vmem:[%s795_s5 + $0xc0] sm:$0xff]  ;;  %v268_v2 = vld [vmem:[%s795_s5 + $0xc8] sm:$0xff]  ;;  %v281_v3 = vpack.c.bf16 %v252_v0, %v251_v63  ;;  %v250_v6 = vld [vmem:[%s795_s5 + $0x38] sm:$0xff] }
  0x11   :  { %132 = vmatpush.bf16.msra.mxu2 %v69_v33  ;;  %146 = vmatpush.bf16.msra.mxu3 %v70_v37  ;;  %v289_v4 = vpack.c.bf16 %v268_v2, %v267_v1  ;;  %v265_v7 = vld [vmem:[%s795_s5 + $0xb0] sm:$0xff]  ;;  %v280_v8 = vpack.c.bf16 %v250_v6, %v249_v5  ;;  %v266_v9 = vld [vmem:[%s795_s5 + $0xb8] sm:$0xff]  ;;  %v34_v10 = vld [vmem:[%s794_s1] sm:$0xff] }
  0x12   :  { %103 = vmatpush.bf16.msra.mxu0 %v71_v57  ;;  %117 = vmatpush.bf16.msra.mxu1 %v72_v60  ;;  %v38_v11 = vld [vmem:[%s794_s1 + $0x20] sm:$0xff]  ;;  %v288_v12 = vpack.c.bf16 %v266_v9, %v265_v7  ;;  %v35_v14 = vld [vmem:[%s794_s1 + $0x8] sm:$0xff]  ;;  %v245_v23 = vld [vmem:[%s795_s5 + $0x10] sm:$0xff] }
  0x13   :  { %v67_v13 = vpack.c.bf16 %v38_v11, %v34_v10  ;;  %v39_v15 = vld [vmem:[%s794_s1 + $0x28] sm:$0xff]  ;;  %v247_v17 = vld [vmem:[%s795_s5 + $0x20] sm:$0xff]  ;;  %v246_v24 = vld [vmem:[%s795_s5 + $0x18] sm:$0xff] }
  0x14   :  { %385 = vmatmul.msk.bf16.vlgmr.msra.gmra.mxu2 %vm93_vm0, %v552_v46  ;;  %386 = vmatmul.msk.bf16.vlgmr.msra.gmra.mxu3 %vm93_vm0, %v552_v46  ;;  %v68_v16 = vpack.c.bf16 %v39_v15, %v35_v14  ;;  %v248_v18 = vld [vmem:[%s795_s5 + $0x28] sm:$0xff]  ;;  %v263_v19 = vld [vmem:[%s795_s5 + $0xa0] sm:$0xff]  ;;  %v261_v25 = vld [vmem:[%s795_s5 + $0x90] sm:$0xff]  ;;  %v278_v26 = vpack.c.bf16 %v246_v24, %v245_v23 }
  0x15   :  { %297 = vmatpush.bf16.msrb.mxu2 %v284_v38  ;;  %311 = vmatpush.bf16.msrb.mxu3 %v292_v41  ;;  %v279_v20 = vpack.c.bf16 %v248_v18, %v247_v17  ;;  %v264_v21 = vld [vmem:[%s795_s5 + $0xa8] sm:$0xff]  ;;  %v262_v27 = vld [vmem:[%s795_s5 + $0x98] sm:$0xff]  ;;  %v243_v29 = vld [vmem:[%s795_s5] sm:$0xff] }
  0x16   :  { %104 = vmatpush.bf16.msra.mxu0 %v67_v13  ;;  %118 = vmatpush.bf16.msra.mxu1 %v68_v16  ;;  %v287_v22 = vpack.c.bf16 %v264_v21, %v263_v19  ;;  %v286_v28 = vpack.c.bf16 %v262_v27, %v261_v25  ;;  %v244_v30 = vld [vmem:[%s795_s5 + $0x8] sm:$0xff]  ;;  %v259_v31 = vld [vmem:[%s795_s5 + $0x80] sm:$0xff]  ;;  %v175_v35 = vld [vmem:[%s797_s3 + $0x70] sm:$0xff] }
  0x17   :  { %v277_v32 = vpack.c.bf16 %v244_v30, %v243_v29  ;;  %v260_v33 = vld [vmem:[%s795_s5 + $0x88] sm:$0xff]  ;;  %v176_v36 = vld [vmem:[%s797_s3 + $0x78] sm:$0xff]  ;;  %v191_v37 = vld [vmem:[%s797_s3 + $0xf0] sm:$0xff] }
  0x18   :  { %v285_v34 = vpack.c.bf16 %v260_v33, %v259_v31  ;;  %v202_v38 = vpack.c.bf16 %v176_v36, %v175_v35  ;;  %v192_v39 = vld [vmem:[%s797_s3 + $0xf8] sm:$0xff]  ;;  %v173_v40 = vld [vmem:[%s797_s3 + $0x60] sm:$0xff]  ;;  %v174_v41 = vld [vmem:[%s797_s3 + $0x68] sm:$0xff] }
  0x19   :  { %298 = vmatpush.bf16.msrb.mxu2 %v283_v53  ;;  %312 = vmatpush.bf16.msrb.mxu3 %v291_v54  ;;  %v210_v42 = vpack.c.bf16 %v192_v39, %v191_v37  ;;  %v189_v43 = vld [vmem:[%s797_s3 + $0xe0] sm:$0xff]  ;;  %v190_v44 = vld [vmem:[%s797_s3 + $0xe8] sm:$0xff]  ;;  %v201_v45 = vpack.c.bf16 %v174_v41, %v173_v40  ;;  %v171_v47 = vld [vmem:[%s797_s3 + $0x50] sm:$0xff] }
  0x1a   :  { %383 = vmatmul.msk.bf16.vlgmr.msra.gmra.mxu0 %vm93_vm0, %v552_v46  ;;  %384 = vmatmul.msk.bf16.vlgmr.msra.gmra.mxu1 %vm93_vm0, %v552_v46  ;;  %v209_v46 = vpack.c.bf16 %v190_v44, %v189_v43  ;;  %v172_v48 = vld [vmem:[%s797_s3 + $0x58] sm:$0xff]  ;;  %v187_v49 = vld [vmem:[%s797_s3 + $0xd0] sm:$0xff]  ;;  %v169_v53 = vld [vmem:[%s797_s3 + $0x40] sm:$0xff] }
  0x1b   :  { %215 = vmatpush.bf16.msrb.mxu0 %v202_v38  ;;  %229 = vmatpush.bf16.msrb.mxu1 %v210_v42  ;;  %v188_v50 = vld [vmem:[%s797_s3 + $0xd8] sm:$0xff]  ;;  %v200_v51 = vpack.c.bf16 %v172_v48, %v171_v47  ;;  %v170_v54 = vld [vmem:[%s797_s3 + $0x48] sm:$0xff]  ;;  %v185_v55 = vld [vmem:[%s797_s3 + $0xc0] sm:$0xff] }
  0x1c   :  { %v208_v52 = vpack.c.bf16 %v188_v50, %v187_v49  ;;  %v186_v56 = vld [vmem:[%s797_s3 + $0xc8] sm:$0xff]  ;;  %v199_v57 = vpack.c.bf16 %v170_v54, %v169_v53  ;;  %v712_v59 = vld [vmem:[%s799_s2] sm:$0xf]  ;;  %v168_v13 = vld [vmem:[%s797_s3 + $0x38] sm:$0xff] }
  0x1d   :  { %299 = vmatpush.bf16.msrb.mxu2 %v282_v61  ;;  %313 = vmatpush.bf16.msrb.mxu3 %v290_v62  ;;  %v207_v58 = vpack.c.bf16 %v186_v56, %v185_v55  ;;  %v87_v62 = vperm.slane %v712_v59, 2  ;;  %v88_v63 = vperm.slane %v712_v59, 3  ;;  %v183_v15 = vld [vmem:[%s797_s3 + $0xb0] sm:$0xff]  ;;  %v184_v16 = vld [vmem:[%s797_s3 + $0xb8] sm:$0xff]  ;;  %v165_v17 = vld [vmem:[%s797_s3 + $0x20] sm:$0xff]  ;;  %v85_v37 = vperm.slane %v712_v59, 0 }
  0x1e   :  { %v206_v18 = vpack.c.bf16 %v184_v16, %v183_v15  ;;  %v166_v19 = vld [vmem:[%s797_s3 + $0x28] sm:$0xff]  ;;  %v163_v24 = vld [vmem:[%s797_s3 + $0x10] sm:$0xff]  ;;  %v164_v25 = vld [vmem:[%s797_s3 + $0x18] sm:$0xff]  ;;  %v86_v39 = vperm.slane %v712_v59, 1 }
  0x1f   :  { %216 = vmatpush.bf16.msrb.mxu0 %v201_v45  ;;  %230 = vmatpush.bf16.msrb.mxu1 %v209_v46  ;;  %v182_v21 = vld [vmem:[%s797_s3 + $0xa8] sm:$0xff]  ;;  %v179_v27 = vld [vmem:[%s797_s3 + $0x90] sm:$0xff]  ;;  %v161_v29 = vld [vmem:[%s797_s3] sm:$0xff] }
  0x20   :  { %v162_v31 = vld [vmem:[%s797_s3 + $0x8] sm:$0xff] }
  0x21   :  { %300 = vmatpush.bf16.msrb.mxu2 %v281_v3  ;;  %314 = vmatpush.bf16.msrb.mxu3 %v289_v4  ;;  %v178_v33 = vld [vmem:[%s797_s3 + $0x88] sm:$0xff] }
  0x23   :  { %217 = vmatpush.bf16.msrb.mxu0 %v200_v51  ;;  %231 = vmatpush.bf16.msrb.mxu1 %v208_v52  ;;  %v388_v52 = vld [vmem:[%s798_s6] ss:$0 sm:$0xff] }
  0x25   :  { %301 = vmatpush.bf16.msrb.mxu2 %v280_v8  ;;  %315 = vmatpush.bf16.msrb.mxu3 %v288_v12  ;;  %v167_v12 = vld [vmem:[%s797_s3 + $0x30] sm:$0xff] }
  0x26   :  { %v198_v14 = vpack.c.bf16 %v168_v13, %v167_v12 }
  0x27   :  { %218 = vmatpush.bf16.msrb.mxu0 %v199_v57  ;;  %232 = vmatpush.bf16.msrb.mxu1 %v207_v58  ;;  %v15_v58 = vstv %s800_s4 }
  0x28   :  { %16 = vst [vmem:[#allocation2] sm:$0x1] %v15_v58 }
  0x29   :  { %302 = vmatpush.bf16.msrb.mxu2 %v279_v20  ;;  %316 = vmatpush.bf16.msrb.mxu3 %v287_v22  ;;  %v181_v20 = vld [vmem:[%s797_s3 + $0xa0] sm:$0xff]  ;;  %v197_v22 = vpack.c.bf16 %v166_v19, %v165_v17 }
  0x2a   :  { %v205_v23 = vpack.c.bf16 %v182_v21, %v181_v20 }
  0x2b   :  { %219 = vmatpush.bf16.msrb.mxu0 %v198_v14  ;;  %233 = vmatpush.bf16.msrb.mxu1 %v206_v18 }
  0x2d   :  { %303 = vmatpush.bf16.msrb.mxu2 %v278_v26  ;;  %317 = vmatpush.bf16.msrb.mxu3 %v286_v28  ;;  %v196_v26 = vpack.c.bf16 %v164_v25, %v163_v24  ;;  %v180_v28 = vld [vmem:[%s797_s3 + $0x98] sm:$0xff] }
  0x2e   :  { %v204_v30 = vpack.c.bf16 %v180_v28, %v179_v27 }
  0x2f   :  { %220 = vmatpush.bf16.msrb.mxu0 %v197_v22  ;;  %234 = vmatpush.bf16.msrb.mxu1 %v205_v23  ;;  %v389_v24 = vld [vmem:[#allocation2] ss:$0 sm:$0xff] }
  0x31   :  { %304 = vmatpush.bf16.msrb.mxu2 %v277_v32  ;;  %318 = vmatpush.bf16.msrb.mxu3 %v285_v34  ;;  %v177_v32 = vld [vmem:[%s797_s3 + $0x80] sm:$0xff]  ;;  %v195_v34 = vpack.c.bf16 %v162_v31, %v161_v29 }
  0x32   :  { %v203_v35 = vpack.c.bf16 %v178_v33, %v177_v32 }
  0x33   :  { %221 = vmatpush.bf16.msrb.mxu0 %v196_v26  ;;  %235 = vmatpush.bf16.msrb.mxu1 %v204_v30 }
  0x37   :  { %222 = vmatpush.bf16.msrb.mxu0 %v195_v34  ;;  %236 = vmatpush.bf16.msrb.mxu1 %v203_v35 }
  0x97   :  { %v134_v60 = vpop.f32.mrf.mxu2  ;;  %v148_v61 = vpop.f32.mrf.mxu3 }
  0x98   :  { %v135_v0 = vadd.f32 %v134_v60, %v87_v62  ;;  %v149_v1 = vadd.f32 %v148_v61, %v88_v63  ;;  %v106_v36 = vpop.f32.mrf.mxu0  ;;  %v120_v38 = vpop.f32.mrf.mxu1 }
  0x99   :  { %v107_v40 = vadd.f32 %v106_v36, %v85_v37  ;;  %v121_v41 = vadd.f32 %v120_v38, %v86_v39 }
  0x9a   :  { %v155_v6 = vmax.f32 %v135_v0, 0.0  ;;  %v156_v8 = vmax.f32 %v149_v1, 0.0 }
  0x9b   :  { %v153_v43 = vmax.f32 %v107_v40, 0.0  ;;  %v154_v46 = vmax.f32 %v121_v41, 0.0 }
  0x9f   :  { %v136_v2 = vpop.f32.mrf.mxu2  ;;  %v150_v4 = vpop.f32.mrf.mxu3 }
  0xa0   :  { %v137_v3 = vadd.f32 %v136_v2, %v87_v62  ;;  %v151_v5 = vadd.f32 %v150_v4, %v88_v63  ;;  %v108_v42 = vpop.f32.mrf.mxu0  ;;  %v122_v45 = vpop.f32.mrf.mxu1 }
  0xa1   :  { %v109_v44 = vadd.f32 %v108_v42, %v85_v37  ;;  %v123_v48 = vadd.f32 %v122_v45, %v86_v39 }
  0xa2   :  { %v159_v7 = vmax.f32 %v137_v3, 0.0  ;;  %v160_v9 = vmax.f32 %v151_v5, 0.0 }
  0xa3   :  { %v157_v47 = vmax.f32 %v109_v44, 0.0  ;;  %v158_v50 = vmax.f32 %v123_v48, 0.0 }
  0xa4   :  { %v275_v10 = vpack.c.bf16 %v159_v7, %v155_v6  ;;  %v276_v11 = vpack.c.bf16 %v160_v9, %v156_v8 }
  0xa5   :  { %v193_v49 = vpack.c.bf16 %v157_v47, %v153_v43  ;;  %v194_v51 = vpack.c.bf16 %v158_v50, %v154_v46 }
  0xa6   :  { %305 = vmatmul.bf16.vlgmr.msrb.gmra.mxu2 %v275_v10  ;;  %319 = vmatmul.bf16.vlgmr.msrb.gmra.mxu3 %v276_v11 }
  0xa7   :  { %223 = vmatmul.bf16.vlgmr.msrb.gmra.mxu0 %v193_v49  ;;  %237 = vmatmul.bf16.vlgmr.msrb.gmra.mxu1 %v194_v51 }
 0x124   :  { %v224_v25 = vpop.f32.mrf.mxu0  ;;  %v238_v27 = vpop.f32.mrf.mxu1 }
 0x125   :  { %v225_v26 = vadd.f32 %v389_v24, %v224_v25 }
 0x127   :  { %v239_v28 = vadd.f32 %v238_v27, %v225_v26 }
 0x129   :  { %v306_v53 = vpop.f32.mrf.mxu2  ;;  %v320_v55 = vpop.f32.mrf.mxu3  ;;  %369 = vst.msk [vmem:[%s802_s9] sm:$0xff] %vm368_vm6, %v239_v28 }
 0x12a   :  { %v307_v54 = vadd.f32 %v388_v52, %v306_v53 }
 0x12c   :  { %v321_v56 = vadd.f32 %v320_v55, %v307_v54  ;;  %v226_v29 = vpop.f32.mrf.mxu0  ;;  %v240_v31 = vpop.f32.mrf.mxu1 }
 0x12d   :  { %v227_v30 = vadd.f32 %v389_v24, %v226_v29 }
 0x12e   :  { %390 = vtanh.f32 %v321_v56  ;;  %v332_v57 = vmin.f32 %v321_v56, 20.0  ;;  %vm330_vm3 = vcmp.gt.f32.partialorder %v321_v56, 20.0 }
 0x12f   :  { %v241_v32 = vadd.f32 %v240_v31, %v227_v30 }
 0x130   :  { %v334_v59 = vmul.f32 1.442695, %v332_v57 }
 0x131   :  { %v308_v60 = vpop.f32.mrf.mxu2  ;;  %v322_v62 = vpop.f32.mrf.mxu3  ;;  %370 = vst.msk [vmem:[%s802_s9 + $0x8] sm:$0xff] %vm368_vm6, %v241_v32 }
 0x132   :  { %392 = vpow2.f32 %v334_v59  ;;  %v309_v61 = vadd.f32 %v388_v52, %v308_v60 }
 0x134   :  { %v391_v63 = vpop.eup %390  ;;  %v323_v0 = vadd.f32 %v322_v62, %v309_v61 }
 0x135   :  { %328 = vst.msk [vmem:[%s801_s7] sm:$0xff] %vm327_vm1, %v391_v63 }
 0x136   :  { %394 = vtanh.f32 %v323_v0  ;;  %v333_v1 = vmin.f32 %v323_v0, 20.0  ;;  %vm331_vm5 = vcmp.gt.f32.partialorder %v323_v0, 20.0 }
 0x138   :  { %v393_v2 = vpop.eup %392  ;;  %v336_v3 = vmul.f32 1.442695, %v333_v1 }
 0x139   :  { %v338_v4 = vadd.f32 1.0, %v393_v2  ;;  %v341_v5 = vmul.f32 -0.5, %v393_v2  ;;  %v344_v8 = vand.u32 2147483647, %v393_v2 }
 0x13a   :  { %396 = vpow2.f32 %v336_v3 }
 0x13b   :  { %398 = vlog2.f32 %v338_v4  ;;  %v342_v7 = vadd.f32 1.0, %v341_v5  ;;  %vm345_vm2 = vcmp.lt.f32.partialorder %v344_v8, 0.0004427343 }
 0x13c   :  { %v395_v6 = vpop.eup %394 }
 0x13d   :  { %329 = vst.msk [vmem:[%s801_s7 + $0x8] sm:$0xff] %vm327_vm1, %v395_v6  ;;  %v343_v13 = vmul.f32 %v393_v2, %v342_v7 }
 0x140   :  { %v397_v9 = vpop.eup %396 }
 0x141   :  { %v399_v10 = vpop.eup %398  ;;  %v347_v11 = vadd.f32 1.0, %v397_v9  ;;  %v350_v14 = vmul.f32 -0.5, %v397_v9  ;;  %v353_v18 = vand.u32 2147483647, %v397_v9 }
 0x142   :  { %v340_v12 = vmul.f32 0.6931472, %v399_v10 }
 0x143   :  { %400 = vlog2.f32 %v347_v11  ;;  %v351_v17 = vadd.f32 1.0, %v350_v14  ;;  %vm354_vm4 = vcmp.lt.f32.partialorder %v353_v18, 0.0004427343 }
 0x144   :  { %v346_v15 = vsel %vm345_vm2, %v343_v13, %v340_v12 }
 0x145   :  { %v356_v16 = vsel %vm330_vm3, %v321_v56, %v346_v15  ;;  %v352_v21 = vmul.f32 %v397_v9, %v351_v17 }
 0x146   :  { %360 = vrot.lane.b32.xlu0 %v356_v16, %s402_s28 }
 0x149   :  { %v401_v19 = vpop.eup %400 }
 0x14a   :  { %v349_v20 = vmul.f32 0.6931472, %v401_v19 }
 0x14c   :  { %v355_v22 = vsel %vm354_vm4, %v352_v21, %v349_v20 }
 0x14d   :  { %v357_v23 = vsel %vm331_vm5, %v323_v0, %v355_v22 }
 0x14e   :  { %362 = vrot.lane.b32.xlu0 %v357_v23, %s402_s28 }
 0x1b8   :  { %v361_v33 = vpop.permute.xlu0 %360 }
 0x1b9   :  { %366 = vst.msk [vmem:[%s803_s8] sm:$0xff] %vm327_vm1, %v361_v33 }
 0x1c0   :  { %v363_v34 = vpop.permute.xlu0 %362 }
 0x1c1   :  { %367 = vst.msk [vmem:[%s803_s8 + $0x8] sm:$0xff] %vm327_vm1, %v363_v34 }

// kernel: transformer_xl_forward.2
= control target key start
LH: loop header
LB: loop body
LE: loop exit
PB: predicated region body
PF: predicated region fallthrough
CT: control target
= control target key end

     0   :  { %19 = vsyncpa [#allocation3], 0  ;;  %s2001_s0 = inlined_call_operand.vmem [shape: f32[32,64], index: 0, kind: input, shape index: {}]   ;;  %s2002_s1 = inlined_call_operand.vmem [shape: f32[16,64], index: 1, kind: input, shape index: {}]   ;;  %s2003_s2 = inlined_call_operand.vmem [shape: f32[1,64], index: 2, kind: input, shape index: {}]   ;;  %s2004_s3 = inlined_call_operand.vmem [shape: f32[1,64], index: 3, kind: input, shape index: {}]   ;;  %s2005_s4 = inlined_call_operand.vmem [shape: f32[64,768], index: 4, kind: input, shape index: {}]   ;;  %s2006_s5 = inlined_call_operand.hbm [shape: f32[1,768], index: 5, kind: input, shape index: {}]   ;;  %s2007_s6 = inlined_call_operand.vmem [shape: f32[256,64], index: 6, kind: input, shape index: {}]   ;;  %s2008_s7 = inlined_call_operand.vmem [shape: f32[1,64], index: 7, kind: input, shape index: {}]   ;;  %s2009_s8 = inlined_call_operand.vmem [shape: f32[1,64], index: 8, kind: input, shape index: {}]   ;;  %s2010_s9 = inlined_call_operand.hbm [shape: f32[1,64], index: 9, kind: input, shape index: {}]   ;;  %s2011_s10 = inlined_call_operand.hbm [shape: f32[64,64], index: 10, kind: input, shape index: {}]   ;;  %s2012_s11 = inlined_call_operand.hbm [shape: f32[1,64], index: 11, kind: input, shape index: {}]   ;;  %s2013_s12 = inlined_call_operand.hbm [shape: f32[64,64], index: 12, kind: input, shape index: {}]   ;;  %s2014_s13 = inlined_call_operand.hbm [shape: f32[1,64], index: 13, kind: input, shape index: {}]   ;;  %s2015_s14 = inlined_call_operand.vmem [shape: f32[16,64], index: 14, kind: output, shape index: {}]  }
   0x1   :  { %20 = vsyncpa [#allocation5], 0 }
   0x2   :  { %21 = vsyncpa [#allocation8], 0  ;;  %s55_s15 = sshll.u32 %s2010_s9, 4  ;;  %s56_s15 = int_to_ptr.hbm [resolvable:$true] %s55_s15 }
   0x3   :  { %22 = vsyncpa [#allocation11], 0  ;;  %s1408_s16 = smov [#allocation4]   ;;  %s79_s20 = sshll.u32 %s2012_s11, 4  ;;  %s80_s20 = int_to_ptr.hbm [resolvable:$true] %s79_s20 }
   0x4   :  { %s57_s17 = sshll.u32 %s1408_s16, 4  ;;  %s1409_s21 = smov [#allocation7]   ;;  %s58_s17 = int_to_ptr.vmem [resolvable:$true] %s57_s17 }
   0x5   :  { %60 = dma.hbm_to_vmem [thread:$0]  %s56_s15, 16, %s58_s17, [#allocation5]  }
   0x6   :  { %s81_s22 = sshll.u32 %s1409_s21, 4  ;;  %s38_s25 = sshll.u32 %s2006_s5, 4  ;;  %s82_s22 = int_to_ptr.vmem [resolvable:$true] %s81_s22  ;;  %s39_s25 = int_to_ptr.hbm [resolvable:$true] %s38_s25 }
   0x7   :  { %84 = dma.hbm_to_vmem [thread:$0]  %s80_s20, 16, %s82_s22, [#allocation8]  }
   0x8   :  { %s65_s27 = sshll.u32 %s2011_s10, 4  ;;  %s1410_s28 = smov [#allocation2]   ;;  %s66_s27 = int_to_ptr.hbm [resolvable:$true] %s65_s27 }
   0x9   :  { %s40_s29 = sshll.u32 %s1410_s28, 4  ;;  %s1411_s11 = smov [#allocation6]   ;;  %s41_s29 = int_to_ptr.vmem [resolvable:$true] %s40_s29 }
   0xa   :  { %43 = dma.hbm_to_vmem [thread:$0]  %s39_s25, 96, %s41_s29, [#allocation3]  }
   0xb   :  { %s67_s30 = sshll.u32 %s1411_s11, 4  ;;  %s1412_s15 = smov 128   ;;  %s68_s30 = int_to_ptr.vmem [resolvable:$true] %s67_s30 }
   0xc   :  { %s1413_s16 = smov 8   ;;  %s89_s18 = sshll.u32 %s2013_s12, 4  ;;  %s90_s18 = int_to_ptr.hbm [resolvable:$true] %s89_s18 }
   0xd   :  { %73 = dma.hbm_to_vmem [thread:$0]  %s66_s27, 1024, %s68_s30, [#allocation5], %s1412_s15, %s1412_s15, %s1413_s16  }
   0xe   :  { %s1414_s19 = smov [#allocation9]   ;;  %s103_s22 = sshll.u32 %s2014_s13, 4  ;;  %s104_s22 = int_to_ptr.hbm [resolvable:$true] %s103_s22 }
   0xf   :  { %s91_s20 = sshll.u32 %s1414_s19, 4  ;;  %s1415_s23 = smov [#allocation10]   ;;  %s92_s20 = int_to_ptr.vmem [resolvable:$true] %s91_s20 }
  0x10   :  { %97 = dma.hbm_to_vmem [thread:$0]  %s90_s18, 1024, %s92_s20, [#allocation8], %s1412_s15, %s1412_s15, %s1413_s16  }
  0x11   :  { %s105_s24 = sshll.u32 %s1415_s23, 4  ;;  %s106_s24 = int_to_ptr.vmem [resolvable:$true] %s105_s24 }
  0x12   :  { %108 = dma.hbm_to_vmem [thread:$0]  %s104_s22, 16, %s106_s24, [#allocation11]  }
  0x13   :  { %1400 = dma.done.wait [#allocation3], 96  }
  0x14   :  { %1401 = vsyncadd [#allocation3], 4294967200 }
  0x15   :  { %1402 = dma.done.wait [#allocation5], 1040  }
  0x16   :  { %1403 = vsyncadd [#allocation5], 4294966256 }
  0x17   :  { %1404 = dma.done.wait [#allocation8], 1040  }
  0x18   :  { %1405 = vsyncadd [#allocation8], 4294966256 }
  0x19   :  { %1406 = dma.done.wait [#allocation11], 16  }
  0x1a   :  { %1407 = vsyncadd [#allocation11], 4294967280  ;;  %vm142_vm0 = vcmask 523264   ;;  %v136_v0 = vld [vmem:[%s2001_s0 + $0x10] sm:$0xff]  ;;  %v134_v1 = vld [vmem:[%s2001_s0] sm:$0xff]  ;;  %v1416_v8 = vmov 64.0  }
  0x1b   :  { %v149_v2 = vsel %vm142_vm0, %v136_v0, 0.0  ;;  %v143_v3 = vsel %vm142_vm0, %v134_v1, 0.0  ;;  %v137_v4 = vld [vmem:[%s2001_s0 + $0x18] sm:$0xff]  ;;  %v135_v5 = vld [vmem:[%s2001_s0 + $0x8] sm:$0xff]  ;;  %1210 = vrcp.f32 %v1416_v8  ;;  %v288_v35 = vld [vmem:[%s2005_s4 + $0x120] sm:$0xff]  ;;  %vm485_vm15 = vcmask 130048  }
  0x1c   :  { %150 = vadd.xlane.f32.xlu1 %v149_v2  ;;  %144 = vadd.xlane.f32.xlu0 %v143_v3  ;;  %v152_v6 = vsel %vm142_vm0, %v137_v4, 0.0  ;;  %v146_v7 = vsel %vm142_vm0, %v135_v5, 0.0  ;;  %v294_v36 = vld [vmem:[%s2005_s4 + $0x150] sm:$0xff]  ;;  %v289_v37 = vld [vmem:[%s2005_s4 + $0x128] sm:$0xff]  ;;  %v295_v39 = vld [vmem:[%s2005_s4 + $0x158] sm:$0xff] }
  0x1d   :  { %v320_v38 = vpack.c.bf16 %v294_v36, %v288_v35  ;;  %v290_v40 = vld [vmem:[%s2005_s4 + $0x130] sm:$0xff]  ;;  %v296_v41 = vld [vmem:[%s2005_s4 + $0x160] sm:$0xff]  ;;  %v321_v42 = vpack.c.bf16 %v295_v39, %v289_v37  ;;  %v291_v44 = vld [vmem:[%s2005_s4 + $0x138] sm:$0xff] }
  0x1e   :  { %v322_v43 = vpack.c.bf16 %v296_v41, %v290_v40  ;;  %v297_v45 = vld [vmem:[%s2005_s4 + $0x168] sm:$0xff]  ;;  %v276_v47 = vld [vmem:[%s2005_s4 + $0xc0] sm:$0xff]  ;;  %v282_v48 = vld [vmem:[%s2005_s4 + $0xf0] sm:$0xff] }
  0x1f   :  { %350 = vmatpush.bf16.msra.mxu0 %v320_v38  ;;  %v323_v46 = vpack.c.bf16 %v297_v45, %v291_v44  ;;  %367 = vmatpush.bf16.msra.mxu1 %v321_v42  ;;  %v277_v49 = vld [vmem:[%s2005_s4 + $0xc8] sm:$0xff]  ;;  %v314_v50 = vpack.c.bf16 %v282_v48, %v276_v47  ;;  %v283_v51 = vld [vmem:[%s2005_s4 + $0xf8] sm:$0xff]  ;;  %v278_v52 = vld [vmem:[%s2005_s4 + $0xd0] sm:$0xff] }
  0x20   :  { %384 = vmatpush.bf16.msra.mxu2 %v322_v43  ;;  %v284_v53 = vld [vmem:[%s2005_s4 + $0x100] sm:$0xff]  ;;  %v315_v54 = vpack.c.bf16 %v283_v51, %v277_v49  ;;  %v279_v56 = vld [vmem:[%s2005_s4 + $0xd8] sm:$0xff]  ;;  %v285_v57 = vld [vmem:[%s2005_s4 + $0x108] sm:$0xff] }
  0x21   :  { %v1211_v9 = vpop.eup %1210  ;;  %403 = vmatpush.bf16.msra.mxu3 %v323_v46  ;;  %v316_v55 = vpack.c.bf16 %v284_v53, %v278_v52  ;;  %v317_v58 = vpack.c.bf16 %v285_v57, %v279_v56  ;;  %v264_v59 = vld [vmem:[%s2005_s4 + $0x60] sm:$0xff]  ;;  %v270_v60 = vld [vmem:[%s2005_s4 + $0x90] sm:$0xff]  ;;  %v265_v61 = vld [vmem:[%s2005_s4 + $0x68] sm:$0xff] }
  0x22   :  { %v156_v10 = vmul.f32 64.0, %v1211_v9  ;;  %vm160_vm1 = vweird.f32 %v1211_v9  ;;  %v308_v62 = vpack.c.bf16 %v270_v60, %v264_v59  ;;  %v271_v63 = vld [vmem:[%s2005_s4 + $0x98] sm:$0xff]  ;;  %v298_v51 = vld [vmem:[%s2005_s4 + $0x170] sm:$0xff]  ;;  %v293_v52 = vld [vmem:[%s2005_s4 + $0x148] sm:$0xff] }
  0x23   :  { %351 = vmatpush.bf16.msra.mxu0 %v314_v50  ;;  %368 = vmatpush.bf16.msra.mxu1 %v315_v54  ;;  %v309_v3 = vpack.c.bf16 %v271_v63, %v265_v61  ;;  %v292_v50 = vld [vmem:[%s2005_s4 + $0x140] sm:$0xff]  ;;  %v286_v61 = vld [vmem:[%s2005_s4 + $0x110] sm:$0xff] }
  0x24   :  { %153 = vadd.xlane.f32.xlu1 %v152_v6  ;;  %147 = vadd.xlane.f32.xlu0 %v146_v7  ;;  %v157_v11 = vsub.f32 1.0, %v156_v10  ;;  %v273_v6 = vld [vmem:[%s2005_s4 + $0xa8] sm:$0xff]  ;;  %v252_v10 = vld [vmem:[%s2005_s4] sm:$0xff]  ;;  %v324_v54 = vpack.c.bf16 %v298_v51, %v292_v50 }
  0x25   :  { %385 = vmatpush.bf16.msra.mxu2 %v316_v55  ;;  %404 = vmatpush.bf16.msra.mxu3 %v317_v58  ;;  %v299_v55 = vld [vmem:[%s2005_s4 + $0x178] sm:$0xff]  ;;  %v280_v60 = vld [vmem:[%s2005_s4 + $0xe0] sm:$0xff] }
  0x26   :  { %v158_v12 = vmul.f32 %v1211_v9, %v157_v11  ;;  %v258_v11 = vld [vmem:[%s2005_s4 + $0x30] sm:$0xff]  ;;  %v325_v59 = vpack.c.bf16 %v299_v55, %v293_v52  ;;  %v318_v63 = vpack.c.bf16 %v286_v61, %v280_v60 }
  0x27   :  { %352 = vmatpush.bf16.msra.mxu0 %v308_v62  ;;  %369 = vmatpush.bf16.msra.mxu1 %v309_v3  ;;  %v281_v62 = vld [vmem:[%s2005_s4 + $0xe8] sm:$0xff] }
  0x28   :  { %v159_v13 = vadd.f32 %v1211_v9, %v158_v12  ;;  %v253_v12 = vld [vmem:[%s2005_s4 + $0x8] sm:$0xff] }
  0x2a   :  { %v1527_v14 = vsel %vm160_vm1, %v1211_v9, %v159_v13 }
  0x8f   :  { %v151_v15 = vpop.xlane.xlu1 %150  ;;  %v145_v16 = vpop.xlane.xlu0 %144 }
  0x90   :  { %v164_v17 = vmul.f32 %v1527_v14, %v151_v15  ;;  %v162_v18 = vmul.f32 %v1527_v14, %v145_v16  ;;  %v302_v15 = vpack.c.bf16 %v258_v11, %v252_v10  ;;  %v259_v16 = vld [vmem:[%s2005_s4 + $0x38] sm:$0xff] }
  0x92   :  { %v1531_v19 = vsub.f32 %v136_v0, %v164_v17  ;;  %v1533_v20 = vsub.f32 %v134_v1, %v162_v18  ;;  %v266_v0 = vld [vmem:[%s2005_s4 + $0x70] sm:$0xff]  ;;  %v272_v1 = vld [vmem:[%s2005_s4 + $0xa0] sm:$0xff]  ;;  %353 = vmatpush.bf16.msra.mxu0 %v302_v15 }
  0x93   :  { %v254_v17 = vld [vmem:[%s2005_s4 + $0x10] sm:$0xff] }
  0x94   :  { %v172_v21 = vmul.f32 %v1531_v19, %v1531_v19  ;;  %v170_v22 = vmul.f32 %v1533_v20, %v1533_v20 }
  0x96   :  { %v180_v23 = vsel %vm142_vm0, %v172_v21, 0.0  ;;  %v174_v24 = vsel %vm142_vm0, %v170_v22, 0.0  ;;  %v303_v21 = vpack.c.bf16 %v259_v16, %v253_v12  ;;  %v260_v22 = vld [vmem:[%s2005_s4 + $0x40] sm:$0xff]  ;;  %422 = vmatpush.bf16.msrb.mxu0 %v324_v54 }
  0x97   :  { %v154_v25 = vpop.xlane.xlu1 %153  ;;  %181 = vadd.xlane.f32.xlu0 %v180_v23  ;;  %175 = vadd.xlane.f32.xlu2 %v174_v24  ;;  %v148_v26 = vpop.xlane.xlu0 %147  ;;  %v255_v23 = vld [vmem:[%s2005_s4 + $0x18] sm:$0xff]  ;;  %v261_v24 = vld [vmem:[%s2005_s4 + $0x48] sm:$0xff] }
  0x98   :  { %v165_v27 = vmul.f32 %v1527_v14, %v154_v25  ;;  %v163_v28 = vmul.f32 %v1527_v14, %v148_v26  ;;  %v304_v25 = vpack.c.bf16 %v260_v22, %v254_v17  ;;  %370 = vmatpush.bf16.msra.mxu1 %v303_v21  ;;  %v305_v26 = vpack.c.bf16 %v261_v24, %v255_v23  ;;  %v262_v17 = vld [vmem:[%s2005_s4 + $0x50] sm:$0xff]  ;;  %v257_v23 = vld [vmem:[%s2005_s4 + $0x28] sm:$0xff]  ;;  %v263_v24 = vld [vmem:[%s2005_s4 + $0x58] sm:$0xff] }
  0x9a   :  { %v1543_v29 = vsub.f32 %v137_v4, %v165_v27  ;;  %v1545_v30 = vsub.f32 %v135_v5, %v163_v28  ;;  %v310_v4 = vpack.c.bf16 %v272_v1, %v266_v0  ;;  %v267_v5 = vld [vmem:[%s2005_s4 + $0x78] sm:$0xff]  ;;  %423 = vmatpush.bf16.msrb.mxu0 %v318_v63 }
  0x9b   :  { %v311_v9 = vpack.c.bf16 %v273_v6, %v267_v5  ;;  %v287_v0 = vld [vmem:[%s2005_s4 + $0x118] sm:$0xff]  ;;  %v274_v5 = vld [vmem:[%s2005_s4 + $0xb0] sm:$0xff]  ;;  %v1203_v6 = vld [vmem:[%s2003_s2] ss:$0 sm:$0xff] }
  0x9c   :  { %v173_v31 = vmul.f32 %v1543_v29, %v1543_v29  ;;  %v171_v32 = vmul.f32 %v1545_v30, %v1545_v30  ;;  %386 = vmatpush.bf16.msra.mxu2 %v310_v4  ;;  %441 = vmatpush.bf16.msrb.mxu1 %v325_v59  ;;  %v319_v3 = vpack.c.bf16 %v287_v0, %v281_v62  ;;  %v268_v4 = vld [vmem:[%s2005_s4 + $0x80] sm:$0xff] }
  0x9d   :  { %405 = vmatpush.bf16.msra.mxu3 %v311_v9  ;;  %v275_v9 = vld [vmem:[%s2005_s4 + $0xb8] sm:$0xff]  ;;  %v312_v12 = vpack.c.bf16 %v274_v5, %v268_v4 }
  0x9e   :  { %v183_v33 = vsel %vm142_vm0, %v173_v31, 0.0  ;;  %v177_v34 = vsel %vm142_vm0, %v171_v32, 0.0 }
  0x9f   :  { %184 = vadd.xlane.f32.xlu1 %v183_v33  ;;  %178 = vadd.xlane.f32.xlu2 %v177_v34 }
  0xa0   :  { %387 = vmatpush.bf16.msra.mxu2 %v304_v25  ;;  %442 = vmatpush.bf16.msrb.mxu1 %v319_v3 }
  0xa1   :  { %406 = vmatpush.bf16.msra.mxu3 %v305_v26  ;;  %424 = vmatpush.bf16.msrb.mxu0 %v312_v12 }
 0x10a   :  { %v176_v2 = vpop.xlane.xlu2 %175  ;;  %v182_v8 = vpop.xlane.xlu0 %181 }
 0x10b   :  { %v186_v7 = vmul.f32 %v176_v2, %v1527_v14  ;;  %v188_v18 = vmul.f32 %v182_v8, %v1527_v14  ;;  %v269_v8 = vld [vmem:[%s2005_s4 + $0x88] sm:$0xff] }
 0x10c   :  { %v313_v16 = vpack.c.bf16 %v275_v9, %v269_v8 }
 0x10d   :  { %v190_v13 = vadd.f32 1e-05, %v186_v7  ;;  %v1651_v27 = vadd.f32 1e-05, %v188_v18  ;;  %v1204_v18 = vld [vmem:[%s2004_s3] ss:$0 sm:$0xff] }
 0x10e   :  { %443 = vmatpush.bf16.msrb.mxu1 %v313_v16  ;;  %s1417_s3 = smov 64  }
 0x10f   :  { %1212 = vrsqrt.f32 %v190_v13  ;;  %vm200_vm3 = vweird.f32 %v190_v13  ;;  %vm220_vm10 = vweird.f32 %v1651_v27 }
 0x110   :  { %1214 = vrsqrt.f32 %v1651_v27 }
 0x112   :  { %v185_v28 = vpop.xlane.xlu1 %184  ;;  %v179_v31 = vpop.xlane.xlu2 %178 }
 0x113   :  { %v189_v32 = vmul.f32 %v185_v28, %v1527_v14  ;;  %v187_v33 = vmul.f32 %v179_v31, %v1527_v14  ;;  %v307_v31 = vpack.c.bf16 %v263_v24, %v257_v23 }
 0x115   :  { %v1213_v34 = vpop.eup %1212  ;;  %v1655_v35 = vadd.f32 1e-05, %v189_v32  ;;  %v191_v36 = vadd.f32 1e-05, %v187_v33  ;;  %444 = vmatpush.bf16.msrb.mxu1 %v307_v31 }
 0x116   :  { %v195_v37 = vmul.f32 %v1213_v34, %v190_v13  ;;  %v1659_v40 = vpop.eup %1214  ;;  %vm201_vm2 = vweird.f32 %v1213_v34 }
 0x117   :  { %1216 = vrsqrt.f32 %v1655_v35  ;;  %v215_v46 = vmul.f32 %v1659_v40, %v1651_v27  ;;  %vm1677_vm4 = vmor %vm200_vm3, %vm201_vm2  ;;  %vm210_vm6 = vweird.f32 %v191_v36  ;;  %vm230_vm8 = vweird.f32 %v1655_v35 }
 0x118   :  { %v196_v38 = vmul.f32 %v1213_v34, %v195_v37  ;;  %1218 = vrsqrt.f32 %v191_v36  ;;  %vm221_vm11 = vweird.f32 %v1659_v40 }
 0x119   :  { %v216_v57 = vmul.f32 %v1659_v40, %v215_v46  ;;  %vm222_vm13 = vmor %vm220_vm10, %vm221_vm11 }
 0x11a   :  { %v197_v39 = vmul.f32 0.5, %v196_v38 }
 0x11b   :  { %v217_v10 = vmul.f32 0.5, %v216_v57 }
 0x11c   :  { %v198_v41 = vsub.f32 1.5, %v197_v39 }
 0x11d   :  { %v1661_v42 = vpop.eup %1216  ;;  %v218_v25 = vsub.f32 1.5, %v217_v10 }
 0x11e   :  { %v1219_v43 = vpop.eup %1218  ;;  %v225_v44 = vmul.f32 %v1661_v42, %v1655_v35  ;;  %v199_v45 = vmul.f32 %v1213_v34, %v198_v41  ;;  %vm231_vm9 = vweird.f32 %v1661_v42 }
 0x11f   :  { %v205_v47 = vmul.f32 %v1219_v43, %v191_v36  ;;  %vm211_vm5 = vweird.f32 %v1219_v43  ;;  %vm232_vm12 = vmor %vm230_vm8, %vm231_vm9 }
 0x120   :  { %v226_v48 = vmul.f32 %v1661_v42, %v225_v44  ;;  %v203_v56 = vsel %vm1677_vm4, %v1213_v34, %v199_v45  ;;  %vm212_vm7 = vmor %vm210_vm6, %vm211_vm5  ;;  %v219_v34 = vmul.f32 %v1659_v40, %v218_v25 }
 0x121   :  { %v206_v49 = vmul.f32 %v1219_v43, %v205_v47  ;;  %v234_v7 = vmul.f32 %v203_v56, %v1533_v20  ;;  %v256_v20 = vld [vmem:[%s2005_s4 + $0x20] sm:$0xff] }
 0x122   :  { %v227_v1 = vmul.f32 0.5, %v226_v48  ;;  %v306_v28 = vpack.c.bf16 %v262_v17, %v256_v20  ;;  %v223_v27 = vsel %vm222_vm13, %v1659_v40, %v219_v34  ;;  %v326_v40 = vld [vmem:[#allocation2] sm:$0x3f] }
 0x123   :  { %v207_v58 = vmul.f32 0.5, %v206_v49  ;;  %v241_v21 = vmul.f32 %v1203_v6, %v234_v7  ;;  %v236_v38 = vmul.f32 %v223_v27, %v1531_v19  ;;  %v328_v45 = vperm.slane %v326_v40, 0 }
 0x124   :  { %v228_v13 = vsub.f32 1.5, %v227_v1  ;;  %425 = vmatpush.bf16.msrb.mxu0 %v306_v28  ;;  %v330_v52 = vperm.slane %v326_v40, 2  ;;  %v331_v53 = vperm.slane %v326_v40, 3  ;;  %v329_v62 = vperm.slane %v326_v40, 1 }
 0x125   :  { %v208_v2 = vsub.f32 1.5, %v207_v58  ;;  %v248_v32 = vadd.f32 %v1204_v18, %v241_v21  ;;  %v243_v41 = vmul.f32 %v1203_v6, %v236_v38  ;;  %v332_v25 = vperm.slane %v326_v40, 4 }
 0x127   :  { %v209_v11 = vmul.f32 %v1219_v43, %v208_v2  ;;  %v250_v44 = vadd.f32 %v1204_v18, %v243_v41 }
 0x129   :  { %v213_v15 = vsel %vm212_vm7, %v1219_v43, %v209_v11 }
 0x12a   :  { %v235_v22 = vmul.f32 %v213_v15, %v1545_v30  ;;  %v229_v30 = vmul.f32 %v1661_v42, %v228_v13 }
 0x12c   :  { %v242_v26 = vmul.f32 %v1203_v6, %v235_v22  ;;  %v233_v36 = vsel %vm232_vm12, %v1661_v42, %v229_v30 }
 0x12d   :  { %v237_v37 = vmul.f32 %v233_v36, %v1543_v29 }
 0x12e   :  { %v249_v33 = vadd.f32 %v1204_v18, %v242_v26  ;;  %v1765_v26 = vperm.slane %v326_v40, 5 }
 0x12f   :  { %v244_v39 = vmul.f32 %v1203_v6, %v237_v37 }
 0x130   :  { %v300_v35 = vpack.c.bf16 %v249_v33, %v248_v32 }
 0x131   :  { %v251_v43 = vadd.f32 %v1204_v18, %v244_v39 }
 0x132   :  { %1153 = vmatmul.msk.bf16.vlgmr.msra.gmra.mxu0 %vm142_vm0, %v300_v35  ;;  %1155 = vmatmul.msk.bf16.vlgmr.msra.gmra.mxu1 %vm142_vm0, %v300_v35 }
 0x133   :  { %1157 = vmatmul.msk.bf16.vlgmr.msra.gmra.mxu2 %vm142_vm0, %v300_v35  ;;  %1159 = vmatmul.msk.bf16.vlgmr.msra.gmra.mxu3 %vm142_vm0, %v300_v35  ;;  %v301_v42 = vpack.c.bf16 %v251_v43, %v250_v44 }
 0x142   :  { %1154 = vmatmul.msk.bf16.gmra.mxu0 %vm142_vm0, %v301_v42  ;;  %1156 = vmatmul.msk.bf16.gmra.mxu1 %vm142_vm0, %v301_v42 }
 0x143   :  { %1158 = vmatmul.msk.bf16.gmra.mxu2 %vm142_vm0, %v301_v42  ;;  %1160 = vmatmul.msk.bf16.gmra.mxu3 %vm142_vm0, %v301_v42 }
 0x152   :  { %1161 = vmatmul.msk.bf16.vlgmr.msrb.gmra.mxu0 %vm142_vm0, %v300_v35  ;;  %1163 = vmatmul.msk.bf16.vlgmr.msrb.gmra.mxu1 %vm142_vm0, %v300_v35 }
 0x162   :  { %1162 = vmatmul.msk.bf16.gmra.mxu0 %vm142_vm0, %v301_v42  ;;  %1164 = vmatmul.msk.bf16.gmra.mxu1 %vm142_vm0, %v301_v42 }
 0x1af   :  { %v355_v19 = vpop.f32.mrf.mxu0  ;;  %v372_v29 = vpop.f32.mrf.mxu1 }
 0x1b6   :  { %v389_v46 = vpop.f32.mrf.mxu2  ;;  %v408_v47 = vpop.f32.mrf.mxu3 }
 0x1b7   :  { %v356_v48 = vpop.f32.mrf.mxu0  ;;  %v373_v49 = vpop.f32.mrf.mxu1  ;;  %v390_v56 = vadd.f32 %v389_v46, %v330_v52  ;;  %v409_v57 = vadd.f32 %v408_v47, %v331_v53  ;;  %v456_v47 = vlaneseq }
 0x1b8   :  { %v357_v50 = vadd.f32 %v356_v48, %v328_v45  ;;  %v374_v3 = vadd.f32 %v373_v49, %v329_v62 }
 0x1ba   :  { %v462_v51 = vpack.c.bf16 %v357_v50, %v357_v50  ;;  %v574_v8 = vpack.c.bf16 %v374_v3, %v374_v3 }
 0x1bc   :  { %516 = vrot.lane.b32.xlu0 %v462_v51, %s1417_s3 }
 0x1be   :  { %v391_v54 = vpop.f32.mrf.mxu2  ;;  %v410_v55 = vpop.f32.mrf.mxu3 }
 0x1bf   :  { %v392_v58 = vadd.f32 %v391_v54, %v330_v52  ;;  %v411_v59 = vadd.f32 %v410_v55, %v331_v53  ;;  %v359_v60 = vpop.f32.mrf.mxu0  ;;  %v376_v61 = vpop.f32.mrf.mxu1  ;;  %v459_v54 = vand.u32 127, %v456_v47 }
 0x1c1   :  { %v463_v63 = vpack.c.bf16 %v392_v58, %v390_v56  ;;  %v575_v0 = vpack.c.bf16 %v411_v59, %v409_v57 }
 0x1c3   :  { %630 = vrot.lane.b32.xlu1 %v575_v0, %s1417_s3  ;;  %519 = vrot.lane.b32.xlu2 %v463_v63, %s1417_s3  ;;  %v468_v1 = vsel %vm142_vm0, %v463_v63, 0  ;;  %v580_v2 = vsel %vm142_vm0, %v575_v0, 0 }
 0x1c4   :  { %477 = vmatpush.bf16.xpose.msrb.mxu2 %v468_v1  ;;  %589 = vmatpush.bf16.xpose.msra.mxu0 %v580_v2 }
 0x1c6   :  { %v394_v4 = vpop.f32.mrf.mxu2  ;;  %v413_v5 = vpop.f32.mrf.mxu3 }
 0x1c7   :  { %v360_v6 = vpop.f32.mrf.mxu0  ;;  %v377_v7 = vpop.f32.mrf.mxu1  ;;  %v395_v12 = vadd.f32 %v394_v4, %v330_v52  ;;  %v414_v13 = vadd.f32 %v413_v5, %v331_v53 }
 0x1c8   :  { %v361_v9 = vadd.f32 %v360_v6, %v328_v45  ;;  %v378_v28 = vadd.f32 %v377_v7, %v329_v62 }
 0x1ca   :  { %v695_v22 = vpack.c.bf16 %v361_v9, %v361_v9  ;;  %v806_v36 = vpack.c.bf16 %v378_v28, %v378_v28 }
 0x1cb   :  { %627 = vrot.lane.b32.xlu2 %v574_v8, %s1417_s3  ;;  %1165 = vmatmul.msk.bf16.vlgmr.msrb.gmra.mxu2 %vm142_vm0, %v462_v51 }
 0x1cc   :  { %1169 = vmatmul.msk.bf16.vlgmr.msra.gmra.mxu0 %vm142_vm0, %v574_v8 }
 0x1ce   :  { %v396_v10 = vpop.f32.mrf.mxu2  ;;  %v415_v11 = vpop.f32.mrf.mxu3 }
 0x1cf   :  { %v397_v15 = vadd.f32 %v396_v10, %v330_v52  ;;  %v416_v16 = vadd.f32 %v415_v11, %v331_v53  ;;  %v427_v20 = vpop.f32.mrf.mxu0  ;;  %v446_v17 = vpop.f32.mrf.mxu1  ;;  %v457_v52 = vshrl.u32 %v456_v47, 7 }
 0x1d0   :  { %v428_v32 = vadd.f32 %v427_v20, %v332_v25  ;;  %v447_v33 = vadd.f32 %v446_v17, %v1765_v26 }
 0x1d1   :  { %v696_v18 = vpack.c.bf16 %v397_v15, %v395_v12  ;;  %v807_v21 = vpack.c.bf16 %v416_v16, %v414_v13  ;;  %v460_v55 = vadd.s32 8, %v457_v52 }
 0x1d3   :  { %862 = vrot.lane.b32.xlu1 %v807_v21, %s1417_s3  ;;  %751 = vrot.lane.b32.xlu0 %v696_v18, %s1417_s3  ;;  %v701_v23 = vsel %vm142_vm0, %v696_v18, 0  ;;  %v812_v24 = vsel %vm142_vm0, %v807_v21, 0  ;;  %vm1789_vm14 = vcmp.le.s32.totalorder %v459_v54, %v460_v55 }
 0x1d4   :  { %748 = vrot.lane.b32.xlu2 %v695_v22, %s1417_s3  ;;  %710 = vmatpush.bf16.xpose.msrb.mxu0 %v701_v23 }
 0x1d7   :  { %v429_v30 = vpop.f32.mrf.mxu0  ;;  %v448_v31 = vpop.f32.mrf.mxu1 }
 0x1d8   :  { %v430_v34 = vadd.f32 %v429_v30, %v332_v25  ;;  %v449_v35 = vadd.f32 %v448_v31, %v1765_v26 }
 0x1da   :  { %v1770_v27 = vpack.c.bf16 %v449_v35, %v447_v33  ;;  %v1772_v37 = vpack.c.bf16 %v430_v34, %v428_v32 }
 0x1db   :  { %859 = vrot.lane.b32.xlu0 %v806_v36, %s1417_s3 }
 0x1dc   :  { %821 = vmatpush.bf16.xpose.msra.mxu0 %v812_v24  ;;  %509 = vmatpush.bf16.msrb.mxu3 %v1772_v37 }
 0x1dd   :  { %1173 = vmatmul.msk.bf16.vlgmr.msrb.gmra.mxu0 %vm142_vm0, %v695_v22  ;;  %620 = vmatpush.bf16.msra.mxu1 %v1770_v27 }
 0x1df   :  { %v432_v38 = vpop.f32.mrf.mxu0  ;;  %v451_v35 = vpop.f32.mrf.mxu1 }
 0x1e0   :  { %v433_v41 = vadd.f32 %v432_v38, %v332_v25 }
 0x1e7   :  { %v434_v39 = vpop.f32.mrf.mxu0 }
 0x1e8   :  { %v435_v43 = vadd.f32 %v434_v39, %v332_v25 }
 0x1ea   :  { %v1778_v44 = vpack.c.bf16 %v435_v43, %v433_v41  ;;  %v453_v41 = vpop.f32.mrf.mxu1 }
 0x1eb   :  { %v454_v43 = vadd.f32 %v453_v41, %v1765_v26 }
 0x1ec   :  { %741 = vmatpush.bf16.msrb.mxu1 %v1778_v44 }
 0x1ed   :  { %1177 = vmatmul.msk.bf16.vlgmr.msra.gmra.mxu0 %vm142_vm0, %v806_v36 }
 0x21d   :  { %v520_v42 = vpop.permute.xlu2 %519 }
 0x21e   :  { %v525_v19 = vsel %vm142_vm0, %v520_v42, 0  ;;  %v452_v42 = vadd.f32 %v451_v35, %v1765_v26 }
 0x21f   :  { %534 = vmatpush.bf16.xpose.msra.mxu2 %v525_v19 }
 0x220   :  { %v1823_v19 = vpack.c.bf16 %v454_v43, %v452_v42 }
 0x225   :  { %v628_v46 = vpop.permute.xlu2 %627 }
 0x22e   :  { %v517_v29 = vpop.permute.xlu0 %516  ;;  %v749_v56 = vpop.permute.xlu2 %748 }
 0x22f   :  { %1167 = vmatmul.msk.bf16.vlgmr.msra.gmra.mxu2 %vm142_vm0, %v517_v29 }
 0x235   :  { %v631_v40 = vpop.permute.xlu1 %630 }
 0x236   :  { %v636_v45 = vsel %vm142_vm0, %v631_v40, 0 }
 0x237   :  { %645 = vmatpush.bf16.xpose.msrb.mxu2 %v636_v45 }
 0x23f   :  { %1171 = vmatmul.msk.bf16.vlgmr.msrb.gmra.mxu2 %vm142_vm0, %v628_v46 }
 0x245   :  { %v863_v48 = vpop.permute.xlu1 %862  ;;  %v752_v49 = vpop.permute.xlu0 %751 }
 0x246   :  { %v868_v50 = vsel %vm142_vm0, %v863_v48, 0  ;;  %v757_v51 = vsel %vm142_vm0, %v752_v49, 0 }
 0x247   :  { %766 = vmatpush.bf16.xpose.msra.mxu2 %v757_v51 }
 0x249   :  { %v591_v53 = vpop.f32.mrf.mxu0 }
 0x24a   :  { %v595_v34 = vmul.f32 0.125, %v591_v53 }
 0x24c   :  { %v596_v38 = vsel %vm1789_vm14, %v595_v34, -1e+30 }
 0x24d   :  { %v860_v1 = vpop.permute.xlu0 %859  ;;  %v597_v39 = vsel %vm485_vm15, %v596_v38, -inf }
 0x24e   :  { %v479_v57 = vpop.f32.mrf.mxu2 }
 0x24f   :  { %877 = vmatpush.bf16.xpose.msrb.mxu2 %v868_v50  ;;  %v483_v58 = vmul.f32 0.125, %v479_v57 }
 0x250   :  { %1175 = vmatmul.msk.bf16.vlgmr.msra.gmra.mxu2 %vm142_vm0, %v749_v56 }
 0x251   :  { %v593_v60 = vpop.f32.mrf.mxu0  ;;  %v484_v61 = vsel %vm1789_vm14, %v483_v58, -1e+30 }
 0x252   :  { %v486_v62 = vsel %vm485_vm15, %v484_v61, -inf }
 0x253   :  { %487 = vmax.xlane.f32.xlu2 %v486_v62 }
 0x256   :  { %v481_v63 = vpop.f32.mrf.mxu2 }
 0x25a   :  { %v1796_v0 = vpop.f32.mrf.mxu0 }
 0x25b   :  { %v716_v51 = vmul.f32 0.125, %v1796_v0 }
 0x25d   :  { %v717_v53 = vsel %vm1789_vm14, %v716_v51, -1e+30 }
 0x25e   :  { %v718_v57 = vsel %vm485_vm15, %v717_v53, -inf }
 0x260   :  { %1179 = vmatmul.msk.bf16.vlgmr.msrb.gmra.mxu2 %vm142_vm0, %v860_v1 }
 0x262   :  { %v714_v2 = vpop.f32.mrf.mxu0 }
 0x26a   :  { %v1799_v3 = vpop.f32.mrf.mxu0 }
 0x26b   :  { %v827_v62 = vmul.f32 0.125, %v1799_v3 }
 0x26d   :  { %v828_v1 = vsel %vm1789_vm14, %v827_v62, -1e+30 }
 0x272   :  { %v825_v4 = vpop.f32.mrf.mxu0 }
 0x2b2   :  { %v536_v5 = vpop.f32.mrf.mxu2 }
 0x2b3   :  { %v540_v6 = vmul.f32 0.125, %v536_v5  ;;  %v829_v5 = vsel %vm485_vm15, %v828_v1, -inf }
 0x2b5   :  { %v541_v7 = vsel %vm1789_vm14, %v540_v6, -1e+30 }
 0x2b6   :  { %v542_v8 = vsel %vm485_vm15, %v541_v7, -inf }
 0x2b7   :  { %543 = vmax.xlane.f32.xlu1 %v542_v8 }
 0x2ba   :  { %v538_v9 = vpop.f32.mrf.mxu2 }
 0x2c2   :  { %v647_v10 = vpop.f32.mrf.mxu2 }
 0x2c3   :  { %v651_v11 = vmul.f32 0.125, %v647_v10 }
 0x2c5   :  { %v652_v12 = vsel %vm1789_vm14, %v651_v11, -1e+30 }
 0x2c6   :  { %v488_v13 = vpop.xlane.xlu2 %487  ;;  %v653_v15 = vsel %vm485_vm15, %v652_v12, -inf }
 0x2c7   :  { %v489_v16 = vsub.f32 %v484_v61, %v488_v13  ;;  %654 = vmax.xlane.f32.xlu0 %v653_v15 }
 0x2c9   :  { %v490_v20 = vmul.f32 1.442695, %v489_v16 }
 0x2ca   :  { %v649_v17 = vpop.f32.mrf.mxu2 }
 0x2cb   :  { %1220 = vpow2.f32 %v490_v20 }
 0x2d1   :  { %v1221_v18 = vpop.eup %1220 }
 0x2d2   :  { %v492_v21 = vsel %vm485_vm15, %v1221_v18, 0.0 }
 0x2d3   :  { %v768_v22 = vpop.f32.mrf.mxu2  ;;  %493 = vadd.xlane.f32.xlu1 %v492_v21 }
 0x2d4   :  { %v772_v23 = vmul.f32 0.125, %v768_v22 }
 0x2d6   :  { %v773_v24 = vsel %vm1789_vm14, %v772_v23, -1e+30 }
 0x2d7   :  { %v774_v25 = vsel %vm485_vm15, %v773_v24, -inf }
 0x2d8   :  { %775 = vmax.xlane.f32.xlu2 %v774_v25 }
 0x2db   :  { %v770_v28 = vpop.f32.mrf.mxu2 }
 0x2e3   :  { %v879_v30 = vpop.f32.mrf.mxu2 }
 0x2e4   :  { %v883_v31 = vmul.f32 0.125, %v879_v30 }
 0x2e6   :  { %v884_v32 = vsel %vm1789_vm14, %v883_v31, -1e+30 }
 0x2e7   :  { %v885_v33 = vsel %vm485_vm15, %v884_v32, -inf }
 0x2e8   :  { %886 = vmax.xlane.f32.xlu0 %v885_v33 }
 0x2eb   :  { %v881_v36 = vpop.f32.mrf.mxu2 }
 0x2ec   :  { %555 = vrot.lane.b32.xlu1 %v1772_v37, %s1417_s3 }
 0x2f0   :  { %598 = vmax.xlane.f32.xlu0 %v597_v39 }
 0x2f4   :  { %787 = vrot.lane.b32.xlu1 %v1778_v44, %s1417_s3 }
 0x2fc   :  { %898 = vrot.lane.b32.xlu1 %v1823_v19, %s1417_s3 }
 0x304   :  { %666 = vrot.lane.b32.xlu0 %v1770_v27, %s1417_s3 }
 0x32a   :  { %v544_v37 = vpop.xlane.xlu1 %543 }
 0x32b   :  { %v545_v29 = vsub.f32 %v541_v7, %v544_v37 }
 0x32d   :  { %v546_v40 = vmul.f32 1.442695, %v545_v29 }
 0x32f   :  { %1222 = vpow2.f32 %v546_v40 }
 0x335   :  { %v1223_v45 = vpop.eup %1222 }
 0x336   :  { %v548_v46 = vsel %vm485_vm15, %v1223_v45, 0.0 }
 0x337   :  { %549 = vadd.xlane.f32.xlu2 %v548_v46 }
 0x33a   :  { %v655_v44 = vpop.xlane.xlu0 %654 }
 0x33b   :  { %v656_v47 = vsub.f32 %v652_v12, %v655_v44 }
 0x33d   :  { %v657_v48 = vmul.f32 1.442695, %v656_v47 }
 0x33f   :  { %1224 = vpow2.f32 %v657_v48 }
 0x345   :  { %v1225_v26 = vpop.eup %1224 }
 0x346   :  { %v494_v49 = vpop.xlane.xlu1 %493  ;;  %v659_v50 = vsel %vm485_vm15, %v1225_v26, 0.0 }
 0x347   :  { %1226 = vrcp.f32 %v494_v49  ;;  %660 = vadd.xlane.f32.xlu2 %v659_v50 }
 0x34b   :  { %v776_v27 = vpop.xlane.xlu2 %775 }
 0x34c   :  { %v777_v52 = vsub.f32 %v773_v24, %v776_v27 }
 0x34d   :  { %v1227_v54 = vpop.eup %1226 }
 0x34e   :  { %v778_v55 = vmul.f32 1.442695, %v777_v52  ;;  %v496_v56 = vmul.f32 %v1227_v54, %v1221_v18 }
 0x34f   :  { %719 = vmax.xlane.f32.xlu2 %v718_v57 }
 0x350   :  { %1228 = vpow2.f32 %v778_v55  ;;  %v497_v58 = vpack.c.bf16 %v496_v56, %v496_v56 }
 0x352   :  { %1166 = vmatmul.msk.bf16.vlgmr.msrb.gmra.mxu3 %vm485_vm15, %v497_v58 }
 0x356   :  { %v1229_v60 = vpop.eup %1228 }
 0x357   :  { %v780_v61 = vsel %vm485_vm15, %v1229_v60, 0.0 }
 0x358   :  { %781 = vadd.xlane.f32.xlu2 %v780_v61 }
 0x35b   :  { %v887_v63 = vpop.xlane.xlu0 %886 }
 0x35c   :  { %v888_v0 = vsub.f32 %v884_v32, %v887_v63 }
 0x35e   :  { %v889_v2 = vmul.f32 1.442695, %v888_v0  ;;  %v556_v4 = vpop.permute.xlu1 %555 }
 0x35f   :  { %568 = vmatpush.bf16.msra.mxu3 %v556_v4 }
 0x360   :  { %1230 = vpow2.f32 %v889_v2  ;;  %830 = vmax.xlane.f32.xlu2 %v829_v5  ;;  %v941_v5 = vld [vmem:[%s2007_s6 + $0x70] sm:$0xff] }
 0x363   :  { %v599_v6 = vpop.xlane.xlu0 %598 }
 0x364   :  { %v600_v7 = vsub.f32 %v596_v38, %v599_v6  ;;  %v942_v6 = vld [vmem:[%s2007_s6 + $0x78] sm:$0xff] }
 0x366   :  { %v1231_v8 = vpop.eup %1230  ;;  %v601_v9 = vmul.f32 1.442695, %v600_v7  ;;  %v788_v20 = vpop.permute.xlu1 %787  ;;  %v957_v7 = vld [vmem:[%s2007_s6 + $0xf0] sm:$0xff] }
 0x367   :  { %v891_v10 = vsel %vm485_vm15, %v1231_v8, 0.0 }
 0x368   :  { %1232 = vpow2.f32 %v601_v9  ;;  %892 = vadd.xlane.f32.xlu0 %v891_v10  ;;  %v958_v9 = vld [vmem:[%s2007_s6 + $0xf8] sm:$0xff]  ;;  %v939_v10 = vld [vmem:[%s2007_s6 + $0x60] sm:$0xff] }
 0x36e   :  { %v1233_v3 = vpop.eup %1232  ;;  %v899_v28 = vpop.permute.xlu1 %898 }
 0x36f   :  { %v603_v11 = vsel %vm485_vm15, %v1233_v3, 0.0 }
 0x370   :  { %604 = vadd.xlane.f32.xlu2 %v603_v11  ;;  %v976_v11 = vpack.c.bf16 %v958_v9, %v957_v7  ;;  %v138_v9 = vld [vmem:[%s2002_s1] sm:$0xff] }
 0x376   :  { %v667_v59 = vpop.permute.xlu0 %666 }
 0x377   :  { %679 = vmatpush.bf16.msrb.mxu3 %v667_v59  ;;  %v955_v59 = vld [vmem:[%s2007_s6 + $0xe0] sm:$0xff] }
 0x3aa   :  { %v550_v12 = vpop.xlane.xlu2 %549 }
 0x3ab   :  { %1234 = vrcp.f32 %v550_v12  ;;  %v956_v12 = vld [vmem:[%s2007_s6 + $0xe8] sm:$0xff] }
 0x3b1   :  { %v1235_v13 = vpop.eup %1234 }
 0x3b2   :  { %v552_v15 = vmul.f32 %v1235_v13, %v1223_v45 }
 0x3b4   :  { %v553_v16 = vpack.c.bf16 %v552_v15, %v552_v15  ;;  %v975_v15 = vpack.c.bf16 %v956_v12, %v955_v59 }
 0x3b6   :  { %1168 = vmatmul.msk.bf16.vlgmr.msra.gmra.mxu3 %vm485_vm15, %v553_v16  ;;  %v937_v16 = vld [vmem:[%s2007_s6 + $0x50] sm:$0xff] }
 0x3b7   :  { %800 = vmatpush.bf16.msra.mxu3 %v788_v20  ;;  %v938_v20 = vld [vmem:[%s2007_s6 + $0x58] sm:$0xff] }
 0x3ba   :  { %v661_v17 = vpop.xlane.xlu2 %660 }
 0x3bb   :  { %1236 = vrcp.f32 %v661_v17  ;;  %v953_v17 = vld [vmem:[%s2007_s6 + $0xd0] sm:$0xff] }
 0x3c1   :  { %v1237_v18 = vpop.eup %1236 }
 0x3c2   :  { %v663_v21 = vmul.f32 %v1237_v18, %v1225_v26  ;;  %v720_v22 = vpop.xlane.xlu2 %719  ;;  %v966_v18 = vpack.c.bf16 %v938_v20, %v937_v16 }
 0x3c3   :  { %v721_v23 = vsub.f32 %v717_v53, %v720_v22  ;;  %v935_v22 = vld [vmem:[%s2007_s6 + $0x40] sm:$0xff] }
 0x3c4   :  { %v664_v24 = vpack.c.bf16 %v663_v21, %v663_v21  ;;  %v954_v21 = vld [vmem:[%s2007_s6 + $0xd8] sm:$0xff] }
 0x3c5   :  { %v722_v25 = vmul.f32 1.442695, %v721_v23  ;;  %v936_v23 = vld [vmem:[%s2007_s6 + $0x48] sm:$0xff] }
 0x3c6   :  { %1172 = vmatmul.msk.bf16.vlgmr.msrb.gmra.mxu3 %vm485_vm15, %v664_v24  ;;  %v974_v24 = vpack.c.bf16 %v954_v21, %v953_v17 }
 0x3c7   :  { %1238 = vpow2.f32 %v722_v25  ;;  %911 = vmatpush.bf16.msrb.mxu3 %v899_v28  ;;  %v951_v25 = vld [vmem:[%s2007_s6 + $0xc0] sm:$0xff]  ;;  %v952_v28 = vld [vmem:[%s2007_s6 + $0xc8] sm:$0xff] }
 0x3cb   :  { %v782_v30 = vpop.xlane.xlu2 %781 }
 0x3cc   :  { %1240 = vrcp.f32 %v782_v30  ;;  %v965_v30 = vpack.c.bf16 %v936_v23, %v935_v22 }
 0x3cd   :  { %v1239_v31 = vpop.eup %1238 }
 0x3ce   :  { %v724_v32 = vsel %vm485_vm15, %v1239_v31, 0.0 }
 0x3cf   :  { %725 = vadd.xlane.f32.xlu1 %v724_v32  ;;  %v933_v32 = vld [vmem:[%s2007_s6 + $0x30] sm:$0xff] }
 0x3d2   :  { %v1241_v33 = vpop.eup %1240 }
 0x3d3   :  { %v784_v34 = vmul.f32 %v1241_v33, %v1229_v60  ;;  %v831_v35 = vpop.xlane.xlu2 %830  ;;  %v934_v33 = vld [vmem:[%s2007_s6 + $0x38] sm:$0xff] }
 0x3d4   :  { %v832_v36 = vsub.f32 %v828_v1, %v831_v35  ;;  %v964_v35 = vpack.c.bf16 %v934_v33, %v933_v32 }
 0x3d5   :  { %v785_v38 = vpack.c.bf16 %v784_v34, %v784_v34  ;;  %v1846_v41 = vpop.f32.mrf.mxu3  ;;  %v949_v34 = vld [vmem:[%s2007_s6 + $0xb0] sm:$0xff] }
 0x3d6   :  { %v833_v39 = vmul.f32 1.442695, %v832_v36  ;;  %v950_v36 = vld [vmem:[%s2007_s6 + $0xb8] sm:$0xff] }
 0x3d7   :  { %1176 = vmatmul.msk.bf16.vlgmr.msra.gmra.mxu3 %vm485_vm15, %v785_v38  ;;  %v931_v38 = vld [vmem:[%s2007_s6 + $0x20] sm:$0xff] }
 0x3d8   :  { %1242 = vpow2.f32 %v833_v39  ;;  %v932_v39 = vld [vmem:[%s2007_s6 + $0x28] sm:$0xff] }
 0x3db   :  { %v893_v43 = vpop.xlane.xlu0 %892 }
 0x3dc   :  { %1244 = vrcp.f32 %v893_v43  ;;  %v972_v43 = vpack.c.bf16 %v950_v36, %v949_v34  ;;  %v1075_v34 = vld [vmem:[#allocation6 + $0x30] sm:$0xff] }
 0x3dd   :  { %v513_v37 = vpop.f32.mrf.mxu3 }
 0x3de   :  { %v1243_v42 = vpop.eup %1242  ;;  %v948_v37 = vld [vmem:[%s2007_s6 + $0xa8] sm:$0xff] }
 0x3df   :  { %v835_v29 = vsel %vm485_vm15, %v1243_v42, 0.0 }
 0x3e0   :  { %836 = vadd.xlane.f32.xlu2 %v835_v29  ;;  %v963_v29 = vpack.c.bf16 %v932_v39, %v931_v38  ;;  %v1073_v38 = vld [vmem:[#allocation6 + $0x20] sm:$0xff]  ;;  %v1074_v39 = vld [vmem:[#allocation6 + $0x28] sm:$0xff] }
 0x3e2   :  { %v1245_v40 = vpop.eup %1244 }
 0x3e3   :  { %v895_v45 = vmul.f32 %v1245_v40, %v1231_v8  ;;  %v605_v46 = vpop.xlane.xlu2 %604  ;;  %v968_v8 = vpack.c.bf16 %v942_v6, %v941_v5 }
 0x3e4   :  { %1246 = vrcp.f32 %v605_v46  ;;  %v930_v46 = vld [vmem:[%s2007_s6 + $0x18] sm:$0xff] }
 0x3e5   :  { %v896_v44 = vpack.c.bf16 %v895_v45, %v895_v45  ;;  %977 = vmatpush.bf16.msrb.mxu0 %v968_v8  ;;  %v929_v45 = vld [vmem:[%s2007_s6 + $0x10] sm:$0xff] }
 0x3e7   :  { %1180 = vmatmul.msk.bf16.vlgmr.msrb.gmra.mxu3 %vm485_vm15, %v896_v44  ;;  %v945_v44 = vld [vmem:[%s2007_s6 + $0x90] sm:$0xff] }
 0x3ea   :  { %v1247_v47 = vpop.eup %1246 }
 0x3eb   :  { %v607_v48 = vmul.f32 %v1247_v47, %v1233_v3  ;;  %v940_v3 = vld [vmem:[%s2007_s6 + $0x68] sm:$0xff]  ;;  %v962_v47 = vpack.c.bf16 %v930_v46, %v929_v45 }
 0x3ec   :  { %v967_v13 = vpack.c.bf16 %v940_v3, %v939_v10 }
 0x3ed   :  { %v608_v26 = vpack.c.bf16 %v607_v48, %v607_v48  ;;  %v946_v48 = vld [vmem:[%s2007_s6 + $0x98] sm:$0xff] }
 0x3ee   :  { %978 = vmatpush.bf16.msrb.mxu0 %v967_v13  ;;  %v139_v13 = vld [vmem:[%s2002_s1 + $0x8] sm:$0xff] }
 0x3ef   :  { %1170 = vmatmul.msk.bf16.vlgmr.msra.gmra.mxu1 %vm485_vm15, %v608_v26  ;;  %v970_v26 = vpack.c.bf16 %v946_v48, %v945_v44  ;;  %v1069_v44 = vld [vmem:[#allocation6] sm:$0xff] }
 0x3f0   :  { %852 = vmatpush.bf16.msra.mxu1 %v1823_v19 }
 0x3f2   :  { %979 = vmatpush.bf16.msrb.mxu0 %v966_v18 }
 0x3f6   :  { %980 = vmatpush.bf16.msrb.mxu0 %v965_v30 }
 0x3fa   :  { %981 = vmatpush.bf16.msrb.mxu0 %v964_v35  ;;  %v1076_v35 = vld [vmem:[#allocation6 + $0x38] sm:$0xff] }
 0x3fb   :  { %v1081_v36 = vpack.c.bf16 %v1076_v35, %v1075_v34 }
 0x3fd   :  { %1093 = vmatpush.bf16.msra.mxu2 %v1081_v36 }
 0x3fe   :  { %982 = vmatpush.bf16.msrb.mxu0 %v963_v29 }
 0x402   :  { %983 = vmatpush.bf16.msrb.mxu0 %v962_v47  ;;  %v1070_v47 = vld [vmem:[#allocation6 + $0x8] sm:$0xff] }
 0x403   :  { %v1078_v48 = vpack.c.bf16 %v1070_v47, %v1069_v44 }
 0x439   :  { %v570_v49 = vpop.f32.mrf.mxu3 }
 0x441   :  { %v572_v50 = vpop.f32.mrf.mxu3 }
 0x442   :  { %v726_v51 = vpop.xlane.xlu1 %725  ;;  %v928_v50 = vld [vmem:[%s2007_s6 + $0x8] sm:$0xff] }
 0x443   :  { %1248 = vrcp.f32 %v726_v51  ;;  %v943_v51 = vld [vmem:[%s2007_s6 + $0x80] sm:$0xff] }
 0x449   :  { %v1249_v27 = vpop.eup %1248  ;;  %v681_v52 = vpop.f32.mrf.mxu3 }
 0x44a   :  { %v728_v53 = vmul.f32 %v1249_v27, %v1239_v31  ;;  %v1193_v54 = vpack.i.bf16 %v681_v52, %v570_v49  ;;  %v973_v31 = vpack.c.bf16 %v952_v28, %v951_v25  ;;  %v927_v49 = vld [vmem:[%s2007_s6] sm:$0xff]  ;;  %v944_v52 = vld [vmem:[%s2007_s6 + $0x88] sm:$0xff] }
 0x44b   :  { %v961_v27 = vpack.c.bf16 %v928_v50, %v927_v49 }
 0x44c   :  { %v729_v55 = vpack.c.bf16 %v728_v53, %v728_v53  ;;  %1194 = vrot.lane.b32.xlu2 %v1193_v54, %s1417_s3  ;;  %v969_v53 = vpack.c.bf16 %v944_v52, %v943_v51 }
 0x44d   :  { %984 = vmatpush.bf16.msrb.mxu0 %v961_v27 }
 0x44e   :  { %1174 = vmatmul.msk.bf16.vlgmr.msrb.gmra.mxu1 %vm485_vm15, %v729_v55 }
 0x44f   :  { %991 = vmatpush.bf16.msrb.mxu1 %v976_v11 }
 0x451   :  { %v683_v56 = vpop.f32.mrf.mxu3 }
 0x453   :  { %v837_v57 = vpop.xlane.xlu2 %836  ;;  %992 = vmatpush.bf16.msrb.mxu1 %v975_v15 }
 0x454   :  { %1250 = vrcp.f32 %v837_v57 }
 0x457   :  { %993 = vmatpush.bf16.msrb.mxu1 %v974_v24 }
 0x45a   :  { %v1251_v58 = vpop.eup %1250  ;;  %v802_v60 = vpop.f32.mrf.mxu3 }
 0x45b   :  { %v839_v61 = vmul.f32 %v1251_v58, %v1243_v42  ;;  %994 = vmatpush.bf16.msrb.mxu1 %v973_v31  ;;  %v947_v42 = vld [vmem:[%s2007_s6 + $0xa0] sm:$0xff] }
 0x45c   :  { %v971_v40 = vpack.c.bf16 %v948_v37, %v947_v42  ;;  %v1071_v42 = vld [vmem:[#allocation6 + $0x10] sm:$0xff]  ;;  %v1072_v37 = vld [vmem:[#allocation6 + $0x18] sm:$0xff] }
 0x45d   :  { %v840_v19 = vpack.c.bf16 %v839_v61, %v839_v61 }
 0x45f   :  { %1178 = vmatmul.msk.bf16.vlgmr.msra.gmra.mxu1 %vm485_vm15, %v840_v19 }
 0x460   :  { %995 = vmatpush.bf16.msrb.mxu1 %v972_v43  ;;  %v1080_v43 = vpack.c.bf16 %v1074_v39, %v1073_v38 }
 0x462   :  { %v804_v62 = vpop.f32.mrf.mxu3  ;;  %1094 = vmatpush.bf16.msra.mxu2 %v1080_v43 }
 0x464   :  { %996 = vmatpush.bf16.msrb.mxu1 %v971_v40  ;;  %v1079_v40 = vpack.c.bf16 %v1072_v37, %v1071_v42 }
 0x466   :  { %1095 = vmatpush.bf16.msra.mxu2 %v1079_v40 }
 0x468   :  { %997 = vmatpush.bf16.msrb.mxu1 %v970_v26 }
 0x46a   :  { %v913_v63 = vpop.f32.mrf.mxu3  ;;  %1096 = vmatpush.bf16.msra.mxu2 %v1078_v48 }
 0x46b   :  { %v1198_v0 = vpack.i.bf16 %v913_v63, %v802_v60 }
 0x46c   :  { %v1856_v1 = vpop.f32.mrf.mxu1  ;;  %998 = vmatpush.bf16.msrb.mxu1 %v969_v53 }
 0x46d   :  { %1199 = vrot.lane.b32.xlu0 %v1198_v0, %s1417_s3 }
 0x472   :  { %v915_v2 = vpop.f32.mrf.mxu3 }
 0x474   :  { %v624_v4 = vpop.f32.mrf.mxu1 }
 0x4a6   :  { %v1195_v56 = vpop.permute.xlu2 %1194 }
 0x4a7   :  { %v1197_v58 = vunpack.i.h.bf16 %v1195_v56  ;;  %v1196_v60 = vunpack.i.l.bf16 %v1195_v56 }
 0x4a9   :  { %v694_v63 = vsel %vm142_vm0, %v1856_v1, %v1197_v58  ;;  %v693_v0 = vsel %vm142_vm0, %v1846_v41, %v1196_v60  ;;  %v1205_v41 = vld [vmem:[%s2008_s7] ss:$0 sm:$0xff] }
 0x4cb   :  { %v743_v54 = vpop.f32.mrf.mxu1 }
 0x4d3   :  { %v745_v55 = vpop.f32.mrf.mxu1 }
 0x4dc   :  { %v854_v57 = vpop.f32.mrf.mxu1 }
 0x4df   :  { %v1200_v61 = vpop.permute.xlu0 %1199 }
 0x4e0   :  { %v1202_v19 = vunpack.i.h.bf16 %v1200_v61  ;;  %v1201_v62 = vunpack.i.l.bf16 %v1200_v61 }
 0x4e2   :  { %v926_v2 = vsel %vm142_vm0, %v854_v57, %v1202_v19  ;;  %v925_v4 = vsel %vm142_vm0, %v743_v54, %v1201_v62 }
 0x4e3   :  { %v960_v5 = vpack.c.bf16 %v926_v2, %v694_v63  ;;  %v959_v6 = vpack.c.bf16 %v925_v4, %v693_v0  ;;  %v1207_v2 = vld [vmem:[#allocation4] ss:$0 sm:$0xff] }
 0x4e4   :  { %v856_v7 = vpop.f32.mrf.mxu1 }
 0x4e5   :  { %985 = vmatmul.bf16.vlgmr.msrb.gmra.mxu0 %v959_v6  ;;  %999 = vmatmul.bf16.vlgmr.msrb.gmra.mxu1 %v960_v5 }
 0x562   :  { %v986_v8 = vpop.f32.mrf.mxu0  ;;  %v1000_v10 = vpop.f32.mrf.mxu1 }
 0x563   :  { %v1001_v3 = vadd.f32 %v1000_v10, %v986_v8  ;;  %v1111_v10 = vld [vmem:[#allocation9 + $0x30] sm:$0xff] }
 0x565   :  { %v1005_v1 = vadd.f32 %v1001_v3, %v138_v9  ;;  %v1112_v3 = vld [vmem:[#allocation9 + $0x38] sm:$0xff] }
 0x567   :  { %v1967_v11 = vadd.f32 %v1205_v41, %v1005_v1  ;;  %v1109_v1 = vld [vmem:[#allocation9 + $0x20] sm:$0xff] }
 0x569   :  { %v1015_v59 = vsel %vm142_vm0, %v1967_v11, 0.0 }
 0x56a   :  { %v1002_v12 = vpop.f32.mrf.mxu1  ;;  %1016 = vadd.xlane.f32.xlu2 %v1015_v59  ;;  %v988_v15 = vpop.f32.mrf.mxu0  ;;  %v1110_v59 = vld [vmem:[#allocation9 + $0x28] sm:$0xff] }
 0x56b   :  { %v1003_v16 = vadd.f32 %v1002_v12, %v988_v15  ;;  %v1116_v12 = vpack.c.bf16 %v1110_v59, %v1109_v1  ;;  %v1108_v15 = vld [vmem:[#allocation9 + $0x18] sm:$0xff] }
 0x56d   :  { %v1006_v20 = vadd.f32 %v1003_v16, %v139_v13  ;;  %v1107_v13 = vld [vmem:[#allocation9 + $0x10] sm:$0xff] }
 0x56e   :  { %v1115_v16 = vpack.c.bf16 %v1108_v15, %v1107_v13 }
 0x56f   :  { %v1974_v17 = vadd.f32 %v1205_v41, %v1006_v20  ;;  %v1117_v41 = vpack.c.bf16 %v1112_v3, %v1111_v10  ;;  %v1105_v20 = vld [vmem:[#allocation9] sm:$0xff] }
 0x571   :  { %v1018_v18 = vsel %vm142_vm0, %v1974_v17, 0.0  ;;  %1125 = vmatpush.bf16.msra.mxu3 %v1117_v41 }
 0x572   :  { %1019 = vadd.xlane.f32.xlu1 %v1018_v18  ;;  %v1106_v18 = vld [vmem:[#allocation9 + $0x8] sm:$0xff] }
 0x575   :  { %1126 = vmatpush.bf16.msra.mxu3 %v1116_v12 }
 0x579   :  { %1127 = vmatpush.bf16.msra.mxu3 %v1115_v16 }
 0x5dd   :  { %v1017_v21 = vpop.xlane.xlu2 %1016 }
 0x5de   :  { %v1021_v22 = vmul.f32 %v1017_v21, %v1527_v14  ;;  %v1114_v21 = vpack.c.bf16 %v1106_v18, %v1105_v20 }
 0x5e0   :  { %v1023_v23 = vsub.f32 %v1967_v11, %v1021_v22  ;;  %1128 = vmatpush.bf16.msra.mxu3 %v1114_v21 }
 0x5e2   :  { %v1025_v24 = vmul.f32 %v1023_v23, %v1023_v23 }
 0x5e4   :  { %v1027_v25 = vsel %vm142_vm0, %v1025_v24, 0.0 }
 0x5e5   :  { %1028 = vadd.xlane.f32.xlu1 %v1027_v25  ;;  %v1020_v28 = vpop.xlane.xlu1 %1019 }
 0x5e6   :  { %v1022_v30 = vmul.f32 %v1020_v28, %v1527_v14 }
 0x5e8   :  { %v1024_v31 = vsub.f32 %v1974_v17, %v1022_v30 }
 0x5ea   :  { %v1026_v32 = vmul.f32 %v1024_v31, %v1024_v31 }
 0x5ec   :  { %v1030_v33 = vsel %vm142_vm0, %v1026_v32, 0.0 }
 0x5ed   :  { %1031 = vadd.xlane.f32.xlu0 %v1030_v33  ;;  %v1209_v33 = vld [vmem:[#allocation10] ss:$0 sm:$0xff] }
 0x658   :  { %v1029_v29 = vpop.xlane.xlu1 %1028 }
 0x659   :  { %v1033_v45 = vmul.f32 %v1029_v29, %v1527_v14 }
 0x65b   :  { %v1035_v46 = vadd.f32 1e-05, %v1033_v45 }
 0x65d   :  { %1252 = vrsqrt.f32 %v1035_v46  ;;  %vm1043_vm2 = vweird.f32 %v1035_v46 }
 0x660   :  { %v1032_v26 = vpop.xlane.xlu0 %1031 }
 0x661   :  { %v1034_v49 = vmul.f32 %v1032_v26, %v1527_v14  ;;  %v1206_v14 = vld [vmem:[%s2009_s8] ss:$0 sm:$0xff] }
 0x663   :  { %v1253_v50 = vpop.eup %1252  ;;  %v1036_v51 = vadd.f32 1e-05, %v1034_v49 }
 0x664   :  { %v1038_v27 = vmul.f32 %v1253_v50, %v1035_v46  ;;  %vm1044_vm1 = vweird.f32 %v1253_v50 }
 0x665   :  { %1254 = vrsqrt.f32 %v1036_v51  ;;  %vm1045_vm3 = vmor %vm1043_vm2, %vm1044_vm1  ;;  %vm1053_vm5 = vweird.f32 %v1036_v51 }
 0x666   :  { %v1039_v52 = vmul.f32 %v1253_v50, %v1038_v27 }
 0x668   :  { %v1040_v53 = vmul.f32 0.5, %v1039_v52 }
 0x66a   :  { %v1041_v54 = vsub.f32 1.5, %v1040_v53 }
 0x66b   :  { %v1255_v55 = vpop.eup %1254 }
 0x66c   :  { %v1042_v56 = vmul.f32 %v1253_v50, %v1041_v54  ;;  %v1048_v57 = vmul.f32 %v1255_v55, %v1036_v51  ;;  %vm1054_vm4 = vweird.f32 %v1255_v55 }
 0x66d   :  { %vm1055_vm6 = vmor %vm1053_vm5, %vm1054_vm4 }
 0x66e   :  { %v1049_v58 = vmul.f32 %v1255_v55, %v1048_v57  ;;  %v1046_v60 = vsel %vm1045_vm3, %v1253_v50, %v1042_v56 }
 0x66f   :  { %v1057_v62 = vmul.f32 %v1046_v60, %v1023_v23  ;;  %v1208_v23 = vld [vmem:[#allocation7] ss:$0 sm:$0xff] }
 0x670   :  { %v1050_v61 = vmul.f32 0.5, %v1049_v58 }
 0x671   :  { %v1062_v4 = vmul.f32 %v1206_v14, %v1057_v62 }
 0x672   :  { %v1051_v19 = vsub.f32 1.5, %v1050_v61 }
 0x673   :  { %v1067_v7 = vadd.f32 %v1207_v2, %v1062_v4 }
 0x674   :  { %v1052_v63 = vmul.f32 %v1255_v55, %v1051_v19 }
 0x676   :  { %v1056_v0 = vsel %vm1055_vm6, %v1255_v55, %v1052_v63 }
 0x677   :  { %v1058_v5 = vmul.f32 %v1056_v0, %v1024_v31 }
 0x679   :  { %v1063_v6 = vmul.f32 %v1206_v14, %v1058_v5 }
 0x67b   :  { %v1068_v8 = vadd.f32 %v1207_v2, %v1063_v6 }
 0x67d   :  { %v1077_v9 = vpack.c.bf16 %v1068_v8, %v1067_v7 }
 0x67f   :  { %1181 = vmatmul.msk.bf16.vlgmr.msra.gmra.mxu2 %vm142_vm0, %v1077_v9 }
 0x702   :  { %v1098_v22 = vpop.f32.mrf.mxu2 }
 0x703   :  { %v1099_v24 = vadd.f32 %v1208_v23, %v1098_v22 }
 0x705   :  { %v1103_v30 = vmax.f32 %v1099_v24, 0.0 }
 0x70a   :  { %v1100_v25 = vpop.f32.mrf.mxu2 }
 0x70b   :  { %v1101_v28 = vadd.f32 %v1208_v23, %v1100_v25 }
 0x70d   :  { %v1104_v31 = vmax.f32 %v1101_v28, 0.0 }
 0x70f   :  { %v1113_v32 = vpack.c.bf16 %v1104_v31, %v1103_v30 }
 0x711   :  { %1182 = vmatmul.msk.bf16.vlgmr.msra.gmra.mxu3 %vm142_vm0, %v1113_v32 }
 0x794   :  { %v1130_v34 = vpop.f32.mrf.mxu3 }
 0x795   :  { %v1135_v35 = vadd.f32 %v1130_v34, %v1967_v11 }
 0x797   :  { %v1141_v36 = vadd.f32 %v1209_v33, %v1135_v35 }
 0x799   :  { %1143 = vst.msk [vmem:[%s2015_s14] sm:$0xff] %vm142_vm0, %v1141_v36 }
 0x79c   :  { %v1132_v38 = vpop.f32.mrf.mxu3 }
 0x79d   :  { %v1136_v39 = vadd.f32 %v1132_v38, %v1974_v17 }
 0x79f   :  { %v1142_v43 = vadd.f32 %v1209_v33, %v1136_v39 }
 0x7a1   :  { %1144 = vst.msk [vmem:[%s2015_s14 + $0x8] sm:$0xff] %vm142_vm0, %v1142_v43 }
 0x7a2   :  { %1149 = vsyncpa [#allocation3], 1 }
 0x7a3   :  { %1150 = vsyncpa [#allocation5], 1 }
 0x7a4   :  { %1151 = vsyncpa [#allocation8], 1 }
 0x7a5   :  { %1152 = vsyncpa [#allocation11], 1 }

</bundles_post_ra>
